<compile_context>
chip_gen: v6e
topology: v6e:2x2x1
jax: 0.10.0
libtpu: 0.0.40
codegen_flags: <defaults>
</compile_context>

<pallas_src>
import jax
import jax.numpy as jnp
from jax.experimental import pallas as pl
from jax.experimental.pallas import tpu as pltpu

LANE = 128   # TPU lane width
HALF = 64    # low lanes [0, HALF), upper lanes [HALF, LANE)


def _round_up(n, m):
    return ((n + m - 1) // m) * m


def _pick_tiles(n_pad0, tile_m, tile_k):
    """Row tile tm, K tile tk (multiple of tm), and n_pad divisible by both."""
    tm = min(tile_m, n_pad0)
    n_pad = _round_up(n_pad0, tm)
    k_mult = max(1, min(tile_k // tm, n_pad // tm))
    tk = tm * k_mult
    n_pad = _round_up(n_pad, tk)
    return n_pad, tm, tk


# --------------------------------------------------------------------------
# Kernels
# --------------------------------------------------------------------------
def _sage_project(acc_ref, dinv_ref, xi_ref, wl_ref, wr_ref, b_ref):
    """relu( (A@x * 1/deg) @ Wl + x_i @ Wr + b )  -- matmuls bf16, rest f32."""
    agg = (acc_ref[...] * dinv_ref[...]).astype(jnp.bfloat16)
    z = (jnp.dot(agg, wl_ref[...], preferred_element_type=jnp.float32)
         + jnp.dot(xi_ref[...], wr_ref[...], preferred_element_type=jnp.float32)
         + b_ref[...])
    return jnp.maximum(z, 0.0)


def sage_layer_kernel(a_ref, xk_ref, xi_ref, dinv_ref, wl_ref, wr_ref, b_ref,
                      h_ref, acc_ref):
    """One SAGEConv layer.  Grid (row_tiles, k_tiles); k is the reduction axis.

    a_ref:(tm,tk) bf16 0/1 adjacency | xk_ref:(tk,F) bf16 | xi_ref:(tm,F) bf16
    dinv_ref:(tm,1) f32 | wl/wr:(F,H) bf16 | b:(1,H) f32 | h_ref:(tm,H) bf16
    acc_ref:(tm,F) f32 scratch accumulator.
    """
    k = pl.program_id(1)

    @pl.when(k == 0)
    def _():
        acc_ref[...] = jnp.zeros_like(acc_ref)

    acc_ref[...] += jnp.dot(a_ref[...], xk_ref[...],
                            preferred_element_type=jnp.float32)

    @pl.when(k == pl.num_programs(1) - 1)
    def _():
        h_ref[...] = _sage_project(acc_ref, dinv_ref, xi_ref,
                                   wl_ref, wr_ref, b_ref).astype(h_ref.dtype)


def sage_head_kernel(a_ref, xk_ref, xi_ref, dinv_ref, wl_ref, wr_ref, b_ref,
                     wh_ref, bh_ref, out_ref, acc_ref):
    """Layer-2 SAGEConv fused with the dual head (h2 stays in VMEM).

    wh_ref:(H,128) bf16 -- lanes [0,64) = fc_pred weights, [64,128) = fc_diff.
    out_ref:(tm,128) f32 -- lanes [0,64) = low, [64,128) = upper.
    """
    k = pl.program_id(1)

    @pl.when(k == 0)
    def _():
        acc_ref[...] = jnp.zeros_like(acc_ref)

    acc_ref[...] += jnp.dot(a_ref[...], xk_ref[...],
                            preferred_element_type=jnp.float32)

    @pl.when(k == pl.num_programs(1) - 1)
    def _():
        h2 = _sage_project(acc_ref, dinv_ref, xi_ref, wl_ref, wr_ref, b_ref)
        z = jnp.dot(h2.astype(jnp.bfloat16), wh_ref[...],
                    preferred_element_type=jnp.float32) + bh_ref[...]
        # z lanes [0,64) = pred, [64,128) = diff logit.  Swap halves with a
        # cheap XLU roll, then select per-lane -> single lane-dense output.
        z_sw = pltpu.roll(z, shift=HALF, axis=1)
        lane = jax.lax.broadcasted_iota(jnp.int32, z.shape, 1)
        is_low = lane < HALF
        preds = jnp.where(is_low, z, z_sw)
        diffs = jax.nn.sigmoid(jnp.where(is_low, z_sw, z))
        out_ref[...] = jnp.where(is_low, preds - diffs, preds + diffs)


# --------------------------------------------------------------------------
# pallas_call wrapper
# --------------------------------------------------------------------------
def _sage_layer(a, x_agg, x_self, dinv, wl, wr, b, *, tm, tk, head=None):
    n_pad = a.shape[0]
    f = x_agg.shape[1]
    h = wl.shape[1]
    grid = (n_pad // tm, n_pad // tk)

    in_specs = [
        pl.BlockSpec((tm, tk), lambda i, k: (i, k)),   # A tile
        pl.BlockSpec((tk, f), lambda i, k: (k, 0)),    # x (aggregation side)
        pl.BlockSpec((tm, f), lambda i, k: (i, 0)),    # x (self side)
        pl.BlockSpec((tm, 1), lambda i, k: (i, 0)),    # 1/deg
        pl.BlockSpec((f, h), lambda i, k: (0, 0)),     # W_l (VMEM-resident)
        pl.BlockSpec((f, h), lambda i, k: (0, 0)),     # W_r
        pl.BlockSpec((1, h), lambda i, k: (0, 0)),     # bias
    ]
    args = (a, x_agg, x_self, dinv, wl, wr, b)

    if head is None:
        kernel = sage_layer_kernel
        out_shape = jax.ShapeDtypeStruct((n_pad, h), jnp.bfloat16)
        out_spec = pl.BlockSpec((tm, h), lambda i, k: (i, 0))
    else:
        wh, bh = head
        kernel = sage_head_kernel
        in_specs += [
            pl.BlockSpec((h, LANE), lambda i, k: (0, 0)),   # [wp | wd]
            pl.BlockSpec((1, LANE), lambda i, k: (0, 0)),   # [bp | bd]
        ]
        args = args + (wh, bh)
        out_shape = jax.ShapeDtypeStruct((n_pad, LANE), jnp.float32)
        out_spec = pl.BlockSpec((tm, LANE), lambda i, k: (i, 0))

    return pl.pallas_call(
        kernel,
        out_shape=out_shape,
        grid_spec=pltpu.PrefetchScalarGridSpec(
            num_scalar_prefetch=0,
            grid=grid,
            in_specs=in_specs,
            out_specs=out_spec,
            scratch_shapes=[pltpu.VMEM((tm, f), jnp.float32)],
        ),
        compiler_params=pltpu.CompilerParams(
            dimension_semantics=("parallel", "arbitrary"),
            vmem_limit_bytes=48 * 1024 * 1024),
    )(*args)


# --------------------------------------------------------------------------
# Forward pass
# --------------------------------------------------------------------------
def gqnn_forward(x, edge_index, params, *, tile_m=512, tile_k=2048):
    """x: [N, in_dim] f32, edge_index: [2, E] int32 (row 0 = src, row 1 = dst)."""
    n, in_dim = x.shape
    hidden = params["w1l"].shape[1]

    n_pad, tm, tk = _pick_tiles(_round_up(n, LANE), tile_m, tile_k)
    f1 = _round_up(in_dim, LANE)
    hp = _round_up(hidden, LANE)

    # --- glue: exact 0/1 adjacency, built directly in bf16 at padded size; ---
    # --- mean normalization done in-kernel with an exact f32 1/deg.        ---
    src, dst = edge_index[0], edge_index[1]
    a_pad = jnp.zeros((n_pad, n_pad), jnp.bfloat16).at[dst, src].add(1.0)
    deg = jnp.zeros((n,), jnp.float32).at[dst].add(1.0)
    dinv = jnp.zeros((n_pad, 1), jnp.float32).at[:n, 0].set(
        1.0 / jnp.maximum(deg, 1.0))          # isolated nodes -> zero agg

    # --- single bf16 feature copy feeds both aggregation & self operands ---
    x_pad = jnp.zeros((n_pad, f1), jnp.bfloat16).at[:n, :in_dim].set(
        x.astype(jnp.bfloat16))

    # --- padded weights: bf16 MXU operands, f32 biases ---
    def pad_w(w, rows, cols):
        out = jnp.zeros((rows, cols), jnp.float32)
        return out.at[:w.shape[0], :w.shape[1]].set(w).astype(jnp.bfloat16)

    w1l = pad_w(params["w1l"], f1, hp)
    w1r = pad_w(params["w1r"], f1, hp)
    w2l = pad_w(params["w2l"], hp, hp)
    w2r = pad_w(params["w2r"], hp, hp)
    b1 = jnp.zeros((1, hp), jnp.float32).at[:, :hidden].set(params["b1"])
    b2 = jnp.zeros((1, hp), jnp.float32).at[:, :hidden].set(params["b2"])

    # fused dual head: lanes [0,64) <- fc_pred, lanes [64,128) <- fc_diff
    wh = jnp.zeros((hp, LANE), jnp.float32)
    wh = wh.at[:hidden, :HALF].set(jnp.tile(params["wp"], (1, HALF)))
    wh = wh.at[:hidden, HALF:].set(jnp.tile(params["wd"], (1, HALF)))
    wh = wh.astype(jnp.bfloat16)
    bh = jnp.concatenate([jnp.tile(params["bp"], (1, HALF)),
                          jnp.tile(params["bd"], (1, HALF))], axis=1)

    # --- layer 1, then layer 2 fused with the dual head ---
    h1 = _sage_layer(a_pad, x_pad, x_pad, dinv, w1l, w1r, b1, tm=tm, tk=tk)
    out = _sage_layer(a_pad, h1, h1, dinv, w2l, w2r, b2, tm=tm, tk=tk,
                      head=(wh, bh))

    return out[:n, 0:1], out[:n, HALF:HALF + 1]


# --------------------------------------------------------------------------
# Pure-JAX reference (validation) and synthetic params
# --------------------------------------------------------------------------
def gqnn_reference(x, edge_index, params):
    n = x.shape[0]
    src, dst = edge_index[0], edge_index[1]
    adj = jnp.zeros((n, n), jnp.float32).at[dst, src].add(1.0)
    deg = adj.sum(axis=1, keepdims=True)
    a = adj / jnp.maximum(deg, 1.0)
    h1 = jax.nn.relu(a @ x @ params["w1l"] + x @ params["w1r"] + params["b1"])
    h2 = jax.nn.relu(a @ h1 @ params["w2l"] + h1 @ params["w2r"] + params["b2"])
    preds = h2 @ params["wp"] + params["bp"]
    diffs = jax.nn.sigmoid(h2 @ params["wd"] + params["bd"])
    return preds - diffs, preds + diffs


def init_params(key, in_dim, hidden_dim):
    """Synthetic parameters (PyG SAGEConv: lin_l has bias, lin_r no bias)."""
    ks = jax.random.split(key, 8)
    s_in = 1.0 / jnp.sqrt(jnp.float32(in_dim))
    s_h = 1.0 / jnp.sqrt(jnp.float32(hidden_dim))
    return {
        # conv1 (stored transposed: [in, out] so kernels do x @ W)
        "w1l": jax.random.uniform(ks[0], (in_dim, hidden_dim), jnp.float32, -s_in, s_in),
        "w1r": jax.random.uniform(ks[1], (in_dim, hidden_dim), jnp.float32, -s_in, s_in),
        "b1": jnp.zeros((1, hidden_dim), jnp.float32),
        # conv2
        "w2l": jax.random.uniform(ks[2], (hidden_dim, hidden_dim), jnp.float32, -s_h, s_h),
        "w2r": jax.random.uniform(ks[3], (hidden_dim, hidden_dim), jnp.float32, -s_h, s_h),
        "b2": jnp.zeros((1, hidden_dim), jnp.float32),
        # heads (dual_output=True, fixed_margin=None)
        "wp": jax.random.uniform(ks[4], (hidden_dim, 1), jnp.float32, -s_h, s_h),
        "bp": jax.random.uniform(ks[5], (1, 1), jnp.float32, -s_h, s_h),
        "wd": jax.random.uniform(ks[6], (hidden_dim, 1), jnp.float32, -s_h, s_h),
        "bd": jax.random.uniform(ks[7], (1, 1), jnp.float32, -s_h, s_h),
    }


if __name__ == "__main__":
    key = jax.random.PRNGKey(0)
    k_x, k_e, k_p = jax.random.split(key, 3)

    N, IN_DIM, HIDDEN, E = 16, 8, 32, 48

    x = jax.random.normal(k_x, (N, IN_DIM), jnp.float32)
    edge_index = jax.random.randint(k_e, (2, E), 0, N, jnp.int32)
    params = init_params(k_p, IN_DIM, HIDDEN)

    fwd = jax.jit(gqnn_forward)
    pred_low, pred_upper = fwd(x, edge_index, params)
    jax.block_until_ready((pred_low, pred_upper))

    assert pred_low.shape == (N, 1) and pred_upper.shape == (N, 1)
    # upper = preds + sigmoid(...) >= preds - sigmoid(...) = low, always.
    assert bool(jnp.all(pred_upper >= pred_low))

    # Validate against the pure-JAX f32 reference (bf16 matmul operands).
    ref_low, ref_up = gqnn_reference(x, edge_index, params)
    assert bool(jnp.allclose(pred_low, ref_low, atol=5e-2, rtol=5e-2))
    assert bool(jnp.allclose(pred_upper, ref_up, atol=5e-2, rtol=5e-2))

    print("KERNEL_OK")
</pallas_src>

<mosaic_0001>
module attributes {stable_mosaic.version = 11 : i64} {
  func.func private @main(%arg0: i32) attributes {dimension_semantics = [#tpu.dimension_semantics<core_parallel>], iteration_bounds = array<i64: 2>, tpu.core_type = #tpu.core_type<sc_scalar_subcore>, window_params = []} {
    return
  }
}

module attributes {stable_mosaic.version = 11 : i64} {
  func.func private @main(%arg0: i32) attributes {dimension_semantics = [#tpu.dimension_semantics<core_parallel>], iteration_bounds = array<i64: 2>, tpu.core_type = #tpu.core_type<sc_scalar_subcore>, window_params = []} {
    return
  }
}

module attributes {stable_mosaic.version = 11 : i64} {
  func.func @sage_head_kernel(%arg0: i32, %arg1: i32, %arg2: memref<128x128xbf16, #tpu.memory_space<vmem>>, %arg3: memref<128x128xbf16, #tpu.memory_space<vmem>>, %arg4: memref<128x128xbf16, #tpu.memory_space<vmem>>, %arg5: memref<128x1xf32, #tpu.memory_space<vmem>>, %arg6: memref<128x128xbf16, #tpu.memory_space<vmem>>, %arg7: memref<128x128xbf16, #tpu.memory_space<vmem>>, %arg8: memref<1x128xf32, #tpu.memory_space<vmem>>, %arg9: memref<128x128xbf16, #tpu.memory_space<vmem>>, %arg10: memref<1x128xf32, #tpu.memory_space<vmem>>, %arg11: memref<128x128xf32, #tpu.memory_space<vmem>>, %arg12: memref<128x128xf32, #tpu.memory_space<vmem>>) attributes {dimension_semantics = [#tpu.dimension_semantics<parallel>, #tpu.dimension_semantics<arbitrary>], iteration_bounds = array<i64: 1, 1>, scalar_prefetch = 0 : i64, scratch_operands = 1 : i64, tpu.core_type = #tpu.core_type<tc>, window_params = [{transform_indices = @transform_0, window_bounds = array<i64: 128, 128>}, {transform_indices = @transform_1, window_bounds = array<i64: 128, 128>}, {transform_indices = @transform_2, window_bounds = array<i64: 128, 128>}, {transform_indices = @transform_3, window_bounds = array<i64: 128, 1>}, {pipeline_mode = #tpu.pipeline_mode<synchronous>, transform_indices = @transform_4, window_bounds = array<i64: 128, 128>}, {pipeline_mode = #tpu.pipeline_mode<synchronous>, transform_indices = @transform_5, window_bounds = array<i64: 128, 128>}, {pipeline_mode = #tpu.pipeline_mode<synchronous>, transform_indices = @transform_6, window_bounds = array<i64: 1, 128>}, {pipeline_mode = #tpu.pipeline_mode<synchronous>, transform_indices = @transform_7, window_bounds = array<i64: 128, 128>}, {pipeline_mode = #tpu.pipeline_mode<synchronous>, transform_indices = @transform_8, window_bounds = array<i64: 1, 128>}, {transform_indices = @transform_9, window_bounds = array<i64: 128, 128>}]} {
    %c0_i32 = arith.constant 0 : i32
    %0 = arith.cmpi eq, %arg1, %c0_i32 : i32
    %1 = arith.extui %0 : i1 to i32
    %c0_i32_0 = arith.constant 0 : i32
    %2 = arith.cmpi ne, %1, %c0_i32_0 : i32
    scf.if %2 {
      %cst_10 = arith.constant 0.000000e+00 : f32
      %12 = vector.broadcast %cst_10 : f32 to vector<128x128xf32>
      %c0_11 = arith.constant 0 : index
      %c0_12 = arith.constant 0 : index
      %13 = vector.load %arg12[%c0_11, %c0_12] : memref<128x128xf32, #tpu.memory_space<vmem>>, vector<128x128xf32>
      tpu.vector_store %arg12[%c0_11, %c0_12], %12 {strides = array<i32>} : memref<128x128xf32, #tpu.memory_space<vmem>>, vector<128x128xf32>,
    } else {
    }
    %c0 = arith.constant 0 : index
    %c0_1 = arith.constant 0 : index
    %3 = vector.load %arg12[%c0, %c0_1] : memref<128x128xf32, #tpu.memory_space<vmem>>, vector<128x128xf32>
    %c0_2 = arith.constant 0 : index
    %c0_3 = arith.constant 0 : index
    %4 = vector.load %arg2[%c0_2, %c0_3] : memref<128x128xbf16, #tpu.memory_space<vmem>>, vector<128x128xbf16>
    %c0_4 = arith.constant 0 : index
    %c0_5 = arith.constant 0 : index
    %5 = vector.load %arg3[%c0_4, %c0_5] : memref<128x128xbf16, #tpu.memory_space<vmem>>, vector<128x128xbf16>
    %cst = arith.constant dense<0.000000e+00> : vector<128x128xf32>
    %6 = tpu.matmul %4, %5, %cst {dimension_numbers = #tpu.dot_dimension_numbers<[1], [0], [0], [1], [0, 0, 1, 1], [], []>} : vector<128x128xbf16>, vector<128x128xbf16>, vector<128x128xf32> -> vector<128x128xf32>
    %7 = arith.addf %3, %6 : vector<128x128xf32>
    %c0_6 = arith.constant 0 : index
    %c0_7 = arith.constant 0 : index
    %8 = vector.load %arg12[%c0_6, %c0_7] : memref<128x128xf32, #tpu.memory_space<vmem>>, vector<128x128xf32>
    tpu.vector_store %arg12[%c0_6, %c0_7], %7 {strides = array<i32>} : memref<128x128xf32, #tpu.memory_space<vmem>>, vector<128x128xf32>,
    %c0_i32_8 = arith.constant 0 : i32
    %9 = arith.cmpi eq, %arg1, %c0_i32_8 : i32
    %10 = arith.extui %9 : i1 to i32
    %c0_i32_9 = arith.constant 0 : i32
    %11 = arith.cmpi ne, %10, %c0_i32_9 : i32
    scf.if %11 {
      %c0_10 = arith.constant 0 : index
      %c0_11 = arith.constant 0 : index
      %12 = vector.load %arg12[%c0_10, %c0_11] : memref<128x128xf32, #tpu.memory_space<vmem>>, vector<128x128xf32>
      %c0_12 = arith.constant 0 : index
      %c0_13 = arith.constant 0 : index
      %13 = vector.load %arg5[%c0_12, %c0_13] : memref<128x1xf32, #tpu.memory_space<vmem>>, vector<128x1xf32>
      %14 = vector.broadcast %13 : vector<128x1xf32> to vector<128x128xf32>
      %15 = arith.mulf %12, %14 : vector<128x128xf32>
      %16 = arith.truncf %15 : vector<128x128xf32> to vector<128x128xbf16>
      %c0_14 = arith.constant 0 : index
      %c0_15 = arith.constant 0 : index
      %17 = vector.load %arg6[%c0_14, %c0_15] : memref<128x128xbf16, #tpu.memory_space<vmem>>, vector<128x128xbf16>
      %cst_16 = arith.constant dense<0.000000e+00> : vector<128x128xf32>
      %18 = tpu.matmul %16, %17, %cst_16 {dimension_numbers = #tpu.dot_dimension_numbers<[1], [0], [0], [1], [0, 0, 1, 1], [], []>} : vector<128x128xbf16>, vector<128x128xbf16>, vector<128x128xf32> -> vector<128x128xf32>
      %c0_17 = arith.constant 0 : index
      %c0_18 = arith.constant 0 : index
      %19 = vector.load %arg4[%c0_17, %c0_18] : memref<128x128xbf16, #tpu.memory_space<vmem>>, vector<128x128xbf16>
      %c0_19 = arith.constant 0 : index
      %c0_20 = arith.constant 0 : index
      %20 = vector.load %arg7[%c0_19, %c0_20] : memref<128x128xbf16, #tpu.memory_space<vmem>>, vector<128x128xbf16>
      %cst_21 = arith.constant dense<0.000000e+00> : vector<128x128xf32>
      %21 = tpu.matmul %19, %20, %cst_21 {dimension_numbers = #tpu.dot_dimension_numbers<[1], [0], [0], [1], [0, 0, 1, 1], [], []>} : vector<128x128xbf16>, vector<128x128xbf16>, vector<128x128xf32> -> vector<128x128xf32>
      %22 = arith.addf %18, %21 : vector<128x128xf32>
      %c0_22 = arith.constant 0 : index
      %c0_23 = arith.constant 0 : index
      %23 = vector.load %arg8[%c0_22, %c0_23] : memref<1x128xf32, #tpu.memory_space<vmem>>, vector<1x128xf32>
      %24 = vector.broadcast %23 : vector<1x128xf32> to vector<128x128xf32>
      %25 = arith.addf %22, %24 : vector<128x128xf32>
      %cst_24 = arith.constant 0.000000e+00 : f32
      %26 = vector.broadcast %cst_24 : f32 to vector<128x128xf32>
      %27 = arith.maximumf %25, %26 : vector<128x128xf32>
      %28 = arith.truncf %27 : vector<128x128xf32> to vector<128x128xbf16>
      %c0_25 = arith.constant 0 : index
      %c0_26 = arith.constant 0 : index
      %29 = vector.load %arg9[%c0_25, %c0_26] : memref<128x128xbf16, #tpu.memory_space<vmem>>, vector<128x128xbf16>
      %cst_27 = arith.constant dense<0.000000e+00> : vector<128x128xf32>
      %30 = tpu.matmul %28, %29, %cst_27 {dimension_numbers = #tpu.dot_dimension_numbers<[1], [0], [0], [1], [0, 0, 1, 1], [], []>} : vector<128x128xbf16>, vector<128x128xbf16>, vector<128x128xf32> -> vector<128x128xf32>
      %c0_28 = arith.constant 0 : index
      %c0_29 = arith.constant 0 : index
      %31 = vector.load %arg10[%c0_28, %c0_29] : memref<1x128xf32, #tpu.memory_space<vmem>>, vector<1x128xf32>
      %32 = vector.broadcast %31 : vector<1x128xf32> to vector<128x128xf32>
      %33 = arith.addf %30, %32 : vector<128x128xf32>
      %c64_i32 = arith.constant 64 : i32
      %34 = tpu.dynamic_rotate %33 by %c64_i32 dim 1 : vector<128x128xf32>, i32 -> vector<128x128xf32>
      %35 = tpu.iota {dimensions = array<i32: 1>} : vector<128x128xi32>
      %c64_i32_30 = arith.constant 64 : i32
      %36 = vector.broadcast %c64_i32_30 : i32 to vector<128x128xi32>
      %37 = arith.cmpi slt, %35, %36 : vector<128x128xi32>
      %38 = arith.select %37, %33, %34 : vector<128x128xi1>, vector<128x128xf32>
      %39 = arith.select %37, %34, %33 : vector<128x128xi1>, vector<128x128xf32>
      %40 = arith.negf %39 : vector<128x128xf32>
      %41 = math.exp %40 : vector<128x128xf32>
      %cst_31 = arith.constant 1.000000e+00 : f32
      %42 = vector.broadcast %cst_31 : f32 to vector<128x128xf32>
      %43 = arith.addf %42, %41 : vector<128x128xf32>
      %44 = arith.divf %42, %43 : vector<128x128xf32>
      %45 = arith.subf %38, %44 : vector<128x128xf32>
      %46 = arith.addf %38, %44 : vector<128x128xf32>
      %47 = arith.select %37, %45, %46 : vector<128x128xi1>, vector<128x128xf32>
      %c0_32 = arith.constant 0 : index
      %c0_33 = arith.constant 0 : index
      %48 = vector.load %arg11[%c0_32, %c0_33] : memref<128x128xf32, #tpu.memory_space<vmem>>, vector<128x128xf32>
      tpu.vector_store %arg11[%c0_32, %c0_33], %47 {strides = array<i32>} : memref<128x128xf32, #tpu.memory_space<vmem>>, vector<128x128xf32>,
    } else {
    }
    return
  }
  func.func @transform_0(%arg0: i32, %arg1: i32) -> (i32, i32) {
    %c0_i32 = arith.constant 0 : i32
    return %arg0, %arg1 : i32, i32
  }
  func.func @transform_1(%arg0: i32, %arg1: i32) -> (i32, i32) {
    %c0_i32 = arith.constant 0 : i32
    %c0_i32_0 = arith.constant 0 : i32
    return %arg1, %c0_i32 : i32, i32
  }
  func.func @transform_2(%arg0: i32, %arg1: i32) -> (i32, i32) {
    %c0_i32 = arith.constant 0 : i32
    %c0_i32_0 = arith.constant 0 : i32
    return %arg0, %c0_i32 : i32, i32
  }
  func.func @transform_3(%arg0: i32, %arg1: i32) -> (i32, i32) {
    %c0_i32 = arith.constant 0 : i32
    %c0_i32_0 = arith.constant 0 : i32
    return %arg0, %c0_i32 : i32, i32
  }
  func.func @transform_4(%arg0: i32, %arg1: i32) -> (i32, i32) {
    %c0_i32 = arith.constant 0 : i32
    %c0_i32_0 = arith.constant 0 : i32
    %c0_i32_1 = arith.constant 0 : i32
    return %c0_i32, %c0_i32_0 : i32, i32
  }
  func.func @transform_5(%arg0: i32, %arg1: i32) -> (i32, i32) {
    %c0_i32 = arith.constant 0 : i32
    %c0_i32_0 = arith.constant 0 : i32
    %c0_i32_1 = arith.constant 0 : i32
    return %c0_i32, %c0_i32_0 : i32, i32
  }
  func.func @transform_6(%arg0: i32, %arg1: i32) -> (i32, i32) {
    %c0_i32 = arith.constant 0 : i32
    %c0_i32_0 = arith.constant 0 : i32
    %c0_i32_1 = arith.constant 0 : i32
    return %c0_i32, %c0_i32_0 : i32, i32
  }
  func.func @transform_7(%arg0: i32, %arg1: i32) -> (i32, i32) {
    %c0_i32 = arith.constant 0 : i32
    %c0_i32_0 = arith.constant 0 : i32
    %c0_i32_1 = arith.constant 0 : i32
    return %c0_i32, %c0_i32_0 : i32, i32
  }
  func.func @transform_8(%arg0: i32, %arg1: i32) -> (i32, i32) {
    %c0_i32 = arith.constant 0 : i32
    %c0_i32_0 = arith.constant 0 : i32
    %c0_i32_1 = arith.constant 0 : i32
    return %c0_i32, %c0_i32_0 : i32, i32
  }
  func.func @transform_9(%arg0: i32, %arg1: i32) -> (i32, i32) {
    %c0_i32 = arith.constant 0 : i32
    %c0_i32_0 = arith.constant 0 : i32
    return %arg0, %c0_i32 : i32, i32
  }
}

module attributes {stable_mosaic.version = 11 : i64} {
  func.func @sage_layer_kernel(%arg0: i32, %arg1: i32, %arg2: memref<128x128xbf16, #tpu.memory_space<vmem>>, %arg3: memref<128x128xbf16, #tpu.memory_space<vmem>>, %arg4: memref<128x128xbf16, #tpu.memory_space<vmem>>, %arg5: memref<128x1xf32, #tpu.memory_space<vmem>>, %arg6: memref<128x128xbf16, #tpu.memory_space<vmem>>, %arg7: memref<128x128xbf16, #tpu.memory_space<vmem>>, %arg8: memref<1x128xf32, #tpu.memory_space<vmem>>, %arg9: memref<128x128xbf16, #tpu.memory_space<vmem>>, %arg10: memref<128x128xf32, #tpu.memory_space<vmem>>) attributes {dimension_semantics = [#tpu.dimension_semantics<parallel>, #tpu.dimension_semantics<arbitrary>], iteration_bounds = array<i64: 1, 1>, scalar_prefetch = 0 : i64, scratch_operands = 1 : i64, tpu.core_type = #tpu.core_type<tc>, window_params = [{transform_indices = @transform_0, window_bounds = array<i64: 128, 128>}, {transform_indices = @transform_1, window_bounds = array<i64: 128, 128>}, {transform_indices = @transform_2, window_bounds = array<i64: 128, 128>}, {transform_indices = @transform_3, window_bounds = array<i64: 128, 1>}, {pipeline_mode = #tpu.pipeline_mode<synchronous>, transform_indices = @transform_4, window_bounds = array<i64: 128, 128>}, {pipeline_mode = #tpu.pipeline_mode<synchronous>, transform_indices = @transform_5, window_bounds = array<i64: 128, 128>}, {pipeline_mode = #tpu.pipeline_mode<synchronous>, transform_indices = @transform_6, window_bounds = array<i64: 1, 128>}, {transform_indices = @transform_7, window_bounds = array<i64: 128, 128>}]} {
    %c0_i32 = arith.constant 0 : i32
    %0 = arith.cmpi eq, %arg1, %c0_i32 : i32
    %1 = arith.extui %0 : i1 to i32
    %c0_i32_0 = arith.constant 0 : i32
    %2 = arith.cmpi ne, %1, %c0_i32_0 : i32
    scf.if %2 {
      %cst_10 = arith.constant 0.000000e+00 : f32
      %12 = vector.broadcast %cst_10 : f32 to vector<128x128xf32>
      %c0_11 = arith.constant 0 : index
      %c0_12 = arith.constant 0 : index
      %13 = vector.load %arg10[%c0_11, %c0_12] : memref<128x128xf32, #tpu.memory_space<vmem>>, vector<128x128xf32>
      tpu.vector_store %arg10[%c0_11, %c0_12], %12 {strides = array<i32>} : memref<128x128xf32, #tpu.memory_space<vmem>>, vector<128x128xf32>,
    } else {
    }
    %c0 = arith.constant 0 : index
    %c0_1 = arith.constant 0 : index
    %3 = vector.load %arg10[%c0, %c0_1] : memref<128x128xf32, #tpu.memory_space<vmem>>, vector<128x128xf32>
    %c0_2 = arith.constant 0 : index
    %c0_3 = arith.constant 0 : index
    %4 = vector.load %arg2[%c0_2, %c0_3] : memref<128x128xbf16, #tpu.memory_space<vmem>>, vector<128x128xbf16>
    %c0_4 = arith.constant 0 : index
    %c0_5 = arith.constant 0 : index
    %5 = vector.load %arg3[%c0_4, %c0_5] : memref<128x128xbf16, #tpu.memory_space<vmem>>, vector<128x128xbf16>
    %cst = arith.constant dense<0.000000e+00> : vector<128x128xf32>
    %6 = tpu.matmul %4, %5, %cst {dimension_numbers = #tpu.dot_dimension_numbers<[1], [0], [0], [1], [0, 0, 1, 1], [], []>} : vector<128x128xbf16>, vector<128x128xbf16>, vector<128x128xf32> -> vector<128x128xf32>
    %7 = arith.addf %3, %6 : vector<128x128xf32>
    %c0_6 = arith.constant 0 : index
    %c0_7 = arith.constant 0 : index
    %8 = vector.load %arg10[%c0_6, %c0_7] : memref<128x128xf32, #tpu.memory_space<vmem>>, vector<128x128xf32>
    tpu.vector_store %arg10[%c0_6, %c0_7], %7 {strides = array<i32>} : memref<128x128xf32, #tpu.memory_space<vmem>>, vector<128x128xf32>,
    %c0_i32_8 = arith.constant 0 : i32
    %9 = arith.cmpi eq, %arg1, %c0_i32_8 : i32
    %10 = arith.extui %9 : i1 to i32
    %c0_i32_9 = arith.constant 0 : i32
    %11 = arith.cmpi ne, %10, %c0_i32_9 : i32
    scf.if %11 {
      %c0_10 = arith.constant 0 : index
      %c0_11 = arith.constant 0 : index
      %12 = vector.load %arg10[%c0_10, %c0_11] : memref<128x128xf32, #tpu.memory_space<vmem>>, vector<128x128xf32>
      %c0_12 = arith.constant 0 : index
      %c0_13 = arith.constant 0 : index
      %13 = vector.load %arg5[%c0_12, %c0_13] : memref<128x1xf32, #tpu.memory_space<vmem>>, vector<128x1xf32>
      %14 = vector.broadcast %13 : vector<128x1xf32> to vector<128x128xf32>
      %15 = arith.mulf %12, %14 : vector<128x128xf32>
      %16 = arith.truncf %15 : vector<128x128xf32> to vector<128x128xbf16>
      %c0_14 = arith.constant 0 : index
      %c0_15 = arith.constant 0 : index
      %17 = vector.load %arg6[%c0_14, %c0_15] : memref<128x128xbf16, #tpu.memory_space<vmem>>, vector<128x128xbf16>
      %cst_16 = arith.constant dense<0.000000e+00> : vector<128x128xf32>
      %18 = tpu.matmul %16, %17, %cst_16 {dimension_numbers = #tpu.dot_dimension_numbers<[1], [0], [0], [1], [0, 0, 1, 1], [], []>} : vector<128x128xbf16>, vector<128x128xbf16>, vector<128x128xf32> -> vector<128x128xf32>
      %c0_17 = arith.constant 0 : index
      %c0_18 = arith.constant 0 : index
      %19 = vector.load %arg4[%c0_17, %c0_18] : memref<128x128xbf16, #tpu.memory_space<vmem>>, vector<128x128xbf16>
      %c0_19 = arith.constant 0 : index
      %c0_20 = arith.constant 0 : index
      %20 = vector.load %arg7[%c0_19, %c0_20] : memref<128x128xbf16, #tpu.memory_space<vmem>>, vector<128x128xbf16>
      %cst_21 = arith.constant dense<0.000000e+00> : vector<128x128xf32>
      %21 = tpu.matmul %19, %20, %cst_21 {dimension_numbers = #tpu.dot_dimension_numbers<[1], [0], [0], [1], [0, 0, 1, 1], [], []>} : vector<128x128xbf16>, vector<128x128xbf16>, vector<128x128xf32> -> vector<128x128xf32>
      %22 = arith.addf %18, %21 : vector<128x128xf32>
      %c0_22 = arith.constant 0 : index
      %c0_23 = arith.constant 0 : index
      %23 = vector.load %arg8[%c0_22, %c0_23] : memref<1x128xf32, #tpu.memory_space<vmem>>, vector<1x128xf32>
      %24 = vector.broadcast %23 : vector<1x128xf32> to vector<128x128xf32>
      %25 = arith.addf %22, %24 : vector<128x128xf32>
      %cst_24 = arith.constant 0.000000e+00 : f32
      %26 = vector.broadcast %cst_24 : f32 to vector<128x128xf32>
      %27 = arith.maximumf %25, %26 : vector<128x128xf32>
      %28 = arith.truncf %27 : vector<128x128xf32> to vector<128x128xbf16>
      %c0_25 = arith.constant 0 : index
      %c0_26 = arith.constant 0 : index
      %29 = vector.load %arg9[%c0_25, %c0_26] : memref<128x128xbf16, #tpu.memory_space<vmem>>, vector<128x128xbf16>
      tpu.vector_store %arg9[%c0_25, %c0_26], %28 {strides = array<i32>} : memref<128x128xbf16, #tpu.memory_space<vmem>>, vector<128x128xbf16>,
    } else {
    }
    return
  }
  func.func @transform_0(%arg0: i32, %arg1: i32) -> (i32, i32) {
    %c0_i32 = arith.constant 0 : i32
    return %arg0, %arg1 : i32, i32
  }
  func.func @transform_1(%arg0: i32, %arg1: i32) -> (i32, i32) {
    %c0_i32 = arith.constant 0 : i32
    %c0_i32_0 = arith.constant 0 : i32
    return %arg1, %c0_i32 : i32, i32
  }
  func.func @transform_2(%arg0: i32, %arg1: i32) -> (i32, i32) {
    %c0_i32 = arith.constant 0 : i32
    %c0_i32_0 = arith.constant 0 : i32
    return %arg0, %c0_i32 : i32, i32
  }
  func.func @transform_3(%arg0: i32, %arg1: i32) -> (i32, i32) {
    %c0_i32 = arith.constant 0 : i32
    %c0_i32_0 = arith.constant 0 : i32
    return %arg0, %c0_i32 : i32, i32
  }
  func.func @transform_4(%arg0: i32, %arg1: i32) -> (i32, i32) {
    %c0_i32 = arith.constant 0 : i32
    %c0_i32_0 = arith.constant 0 : i32
    %c0_i32_1 = arith.constant 0 : i32
    return %c0_i32, %c0_i32_0 : i32, i32
  }
  func.func @transform_5(%arg0: i32, %arg1: i32) -> (i32, i32) {
    %c0_i32 = arith.constant 0 : i32
    %c0_i32_0 = arith.constant 0 : i32
    %c0_i32_1 = arith.constant 0 : i32
    return %c0_i32, %c0_i32_0 : i32, i32
  }
  func.func @transform_6(%arg0: i32, %arg1: i32) -> (i32, i32) {
    %c0_i32 = arith.constant 0 : i32
    %c0_i32_0 = arith.constant 0 : i32
    %c0_i32_1 = arith.constant 0 : i32
    return %c0_i32, %c0_i32_0 : i32, i32
  }
  func.func @transform_7(%arg0: i32, %arg1: i32) -> (i32, i32) {
    %c0_i32 = arith.constant 0 : i32
    %c0_i32_0 = arith.constant 0 : i32
    return %arg0, %c0_i32 : i32, i32
  }
}

</mosaic_0001>

<bundles_post_ra>
// kernel: gqnn_forward.2
= control target key start
LH: loop header
LB: loop body
LE: loop exit
PB: predicated region body
PF: predicated region fallthrough
CT: control target
= control target key end

     0   :  { %v1291_v1 = vmov 0   ;;  %s1551_s1 = inlined_call_operand.vmem [shape: bf16[128,128], index: 1, kind: input, shape index: {}, may-alias: {1,2}]   ;;  %s1552_s0 = inlined_call_operand.vmem [shape: bf16[128,128], index: 0, kind: input, shape index: {}]   ;;  %s1553_s3 = inlined_call_operand.vmem [shape: f32[128,1], index: 3, kind: input, shape index: {}]   ;;  %s1554_s5 = inlined_call_operand.vmem [shape: bf16[128,128], index: 5, kind: input, shape index: {}]   ;;  %s1555_s4 = inlined_call_operand.vmem [shape: bf16[128,128], index: 4, kind: input, shape index: {}]   ;;  %s1556_s2 = inlined_call_operand.vmem [shape: bf16[128,128], index: 2, kind: input, shape index: {}, may-alias: {1,2}]   ;;  %s1557_s6 = inlined_call_operand.vmem [shape: f32[1,128], index: 6, kind: input, shape index: {}]   ;;  %s1558_s7 = inlined_call_operand.vmem [shape: bf16[128,128], index: 7, kind: output, shape index: {}]  }
   0x1   :  { %v1251_v0 = vld [vmem:[%s1551_s1 + $0x38] sm:$0xff]   ;;  %1250 = vset.pattern.permute.xlu1 %v1291_v1  ;;  %1249 = vset.pattern.permute.xlu0 %v1291_v1  ;;  %v1252_v2 = vld [vmem:[%s1551_s1 + $0x30] sm:$0xff]   ;;  %v1253_v3 = vld [vmem:[%s1551_s1 + $0x28] sm:$0xff]  }
   0x2   :  { %1136 = vmatprep.subr.bf16.mxu0 %v1251_v0  ;;  %v1254_v4 = vld [vmem:[%s1551_s1 + $0x20] sm:$0xff]   ;;  %v1255_v6 = vld [vmem:[%s1551_s1 + $0x18] sm:$0xff]   ;;  %v1256_v7 = vld [vmem:[%s1551_s1 + $0x10] sm:$0xff]  }
   0x3   :  { %1137 = vmatpush3.bf16.msra.mxu0 %v1251_v0  ;;  %v1259_v5 = vld [vmem:[%s1552_s0] sm:$0xff]   ;;  %v348_v10 = vld [vmem:[%s1553_s3 + $0x48] sm:$0xff]  ;;  %v342_v13 = vld [vmem:[%s1553_s3 + $0x18] sm:$0xff] }
   0x4   :  { %1138 = vmatprep.subr.bf16.mxu0 %v1252_v2  ;;  %1152 = vmatprep.mubr.bf16.mxu0 %v1259_v5  ;;  %v347_v8 = vld [vmem:[%s1553_s3 + $0x40] sm:$0xff]  ;;  %v340_v11 = vld [vmem:[%s1553_s3 + $0x8] sm:$0xff]  ;;  %v341_v14 = vld [vmem:[%s1553_s3 + $0x10] sm:$0xff] }
   0x5   :  { %v339_v9 = vld [vmem:[%s1553_s3] sm:$0xff]  ;;  %397 = vperm.xlu1 %1250, %v347_v8   ;;  %v1257_v12 = vld [vmem:[%s1551_s1 + $0x8] sm:$0xff]   ;;  %v1267_v15 = vld [vmem:[%s1554_s5 + $0x38] sm:$0xff]  }
   0x6   :  { %357 = vperm.xlu0 %1249, %v339_v9   ;;  %v1268_v16 = vld [vmem:[%s1554_s5 + $0x30] sm:$0xff]   ;;  %v1258_v17 = vld [vmem:[%s1551_s1] sm:$0xff]   ;;  %1168 = vmatprep.subr.bf16.mxu1 %v1267_v15  ;;  %v350_v18 = vld [vmem:[%s1553_s3 + $0x58] sm:$0xff] }
   0x7   :  { %1139 = vmatpush3.bf16.msra.mxu0 %v1252_v2  ;;  %v349_v19 = vld [vmem:[%s1553_s3 + $0x50] sm:$0xff]  ;;  %1169 = vmatpush3.bf16.msra.mxu1 %v1267_v15  ;;  %v1269_v20 = vld [vmem:[%s1554_s5 + $0x28] sm:$0xff]   ;;  %v1398_v22 = vld [vmem:[%s1555_s4 + $0x38] sm:$0xff]  }
   0x8   :  { %1140 = vmatprep.subr.bf16.mxu0 %v1253_v3  ;;  %1170 = vmatprep.subr.bf16.mxu1 %v1268_v16  ;;  %v1260_v21 = vld [vmem:[%s1552_s0 + $0x8] sm:$0xff]   ;;  %v1261_v23 = vld [vmem:[%s1552_s0 + $0x10] sm:$0xff]   ;;  %v343_v25 = vld [vmem:[%s1553_s3 + $0x20] sm:$0xff] }
   0x9   :  { %402 = vperm.xlu1 %1250, %v348_v10   ;;  %v344_v24 = vld [vmem:[%s1553_s3 + $0x28] sm:$0xff]  ;;  %v1270_v26 = vld [vmem:[%s1554_s5 + $0x20] sm:$0xff]   ;;  %v1275_v30 = vld [vmem:[%s1555_s4 + $0x30] sm:$0xff]  }
   0xa   :  { %362 = vperm.xlu0 %1249, %v340_v11   ;;  %v352_v27 = vld [vmem:[%s1553_s3 + $0x68] sm:$0xff]  ;;  %v351_v28 = vld [vmem:[%s1553_s3 + $0x60] sm:$0xff]  ;;  %v1271_v31 = vld [vmem:[%s1554_s5 + $0x18] sm:$0xff]  }
   0xb   :  { %1141 = vmatpush3.bf16.msra.mxu0 %v1253_v3  ;;  %1171 = vmatpush3.bf16.msra.mxu1 %v1268_v16  ;;  %v1278_v29 = vld [vmem:[%s1556_s2] sm:$0xff]   ;;  %v1262_v32 = vld [vmem:[%s1552_s0 + $0x18] sm:$0xff]   ;;  %v345_v34 = vld [vmem:[%s1553_s3 + $0x30] sm:$0xff] }
   0xc   :  { %1142 = vmatprep.subr.bf16.mxu0 %v1254_v4  ;;  %1172 = vmatprep.subr.bf16.mxu1 %v1269_v20  ;;  %v346_v33 = vld [vmem:[%s1553_s3 + $0x38] sm:$0xff]  ;;  %v1263_v35 = vld [vmem:[%s1552_s0 + $0x20] sm:$0xff]   ;;  %v1272_v36 = vld [vmem:[%s1554_s5 + $0x10] sm:$0xff]  }
   0xd   :  { %372 = vperm.xlu1 %1250, %v342_v13   ;;  %1184 = vmatprep.mubr.bf16.mxu1 %v1278_v29  ;;  %v1277_v37 = vld [vmem:[%s1555_s4 + $0x28] sm:$0xff]   ;;  %v354_v38 = vld [vmem:[%s1553_s3 + $0x78] sm:$0xff]  ;;  %v353_v39 = vld [vmem:[%s1553_s3 + $0x70] sm:$0xff] }
   0xe   :  { %367 = vperm.xlu0 %1249, %v341_v14   ;;  %v1274_v40 = vld [vmem:[%s1554_s5 + $0x8] sm:$0xff]   ;;  %v1280_v41 = vld [vmem:[%s1555_s4 + $0x20] sm:$0xff]   ;;  %v1265_v43 = vld [vmem:[%s1552_s0 + $0x30] sm:$0xff]  }
   0xf   :  { %1143 = vmatpush3.bf16.msra.mxu0 %v1254_v4  ;;  %1173 = vmatpush3.bf16.msra.mxu1 %v1269_v20  ;;  %v1264_v42 = vld [vmem:[%s1552_s0 + $0x28] sm:$0xff]   ;;  %v1276_v44 = vld [vmem:[%s1554_s5] sm:$0xff]   ;;  %v1281_v45 = vld [vmem:[%s1555_s4 + $0x18] sm:$0xff]  }
  0x10   :  { %1144 = vmatprep.subr.bf16.mxu0 %v1255_v6  ;;  %1174 = vmatprep.subr.bf16.mxu1 %v1270_v26  ;;  %v1279_v46 = vld [vmem:[%s1556_s2 + $0x8] sm:$0xff]   ;;  %v1266_v47 = vld [vmem:[%s1552_s0 + $0x38] sm:$0xff]   ;;  %v1282_v48 = vld [vmem:[%s1556_s2 + $0x10] sm:$0xff]  }
  0x11   :  { %412 = vperm.xlu1 %1250, %v350_v18   ;;  %v1283_v49 = vld [vmem:[%s1556_s2 + $0x18] sm:$0xff]   ;;  %v1284_v50 = vld [vmem:[%s1555_s4 + $0x10] sm:$0xff]   ;;  %v1285_v51 = vld [vmem:[%s1555_s4 + $0x8] sm:$0xff]  }
  0x12   :  { %407 = vperm.xlu0 %1249, %v349_v19   ;;  %v1286_v52 = vld [vmem:[%s1556_s2 + $0x20] sm:$0xff]   ;;  %v1287_v53 = vld [vmem:[%s1556_s2 + $0x28] sm:$0xff]   ;;  %v1289_v55 = vld [vmem:[%s1556_s2 + $0x30] sm:$0xff]  }
  0x13   :  { %1145 = vmatpush3.bf16.msra.mxu0 %v1255_v6  ;;  %1175 = vmatpush3.bf16.msra.mxu1 %v1270_v26  ;;  %v1288_v54 = vld [vmem:[%s1555_s4] sm:$0xff]   ;;  %v1290_v56 = vld [vmem:[%s1556_s2 + $0x38] sm:$0xff]  }
  0x14   :  { %1146 = vmatprep.subr.bf16.mxu0 %v1256_v7  ;;  %1176 = vmatprep.subr.bf16.mxu1 %v1271_v31 }
  0x15   :  { %382 = vperm.xlu1 %1250, %v344_v24  }
  0x16   :  { %377 = vperm.xlu0 %1249, %v343_v25  }
  0x17   :  { %1147 = vmatpush3.bf16.msra.mxu0 %v1256_v7  ;;  %1177 = vmatpush3.bf16.msra.mxu1 %v1271_v31 }
  0x18   :  { %1148 = vmatprep.subr.bf16.mxu0 %v1257_v12  ;;  %1178 = vmatprep.subr.bf16.mxu1 %v1272_v36 }
  0x19   :  { %422 = vperm.xlu1 %1250, %v352_v27  }
  0x1a   :  { %417 = vperm.xlu0 %1249, %v351_v28  }
  0x1b   :  { %1149 = vmatpush3.bf16.msra.mxu0 %v1257_v12  ;;  %1179 = vmatpush3.bf16.msra.mxu1 %v1272_v36 }
  0x1c   :  { %1150 = vmatprep.subr.bf16.mxu0 %v1258_v17  ;;  %1180 = vmatprep.subr.bf16.mxu1 %v1274_v40 }
  0x1d   :  { %392 = vperm.xlu1 %1250, %v346_v33  }
  0x1e   :  { %387 = vperm.xlu0 %1249, %v345_v34  }
  0x1f   :  { %1151 = vmatpush3.bf16.msra.mxu0 %v1258_v17  ;;  %1181 = vmatpush3.bf16.msra.mxu1 %v1274_v40 }
  0x20   :  { %1200 = vmatprep.subr.bf16.mxu0 %v1398_v22  ;;  %1182 = vmatprep.subr.bf16.mxu1 %v1276_v44 }
  0x21   :  { %432 = vperm.xlu1 %1250, %v354_v38  }
  0x22   :  { %1153 = vmatmul.mubr.bf16.vlgmr.msra.gmra.mxu0 %v1260_v21  ;;  %427 = vperm.xlu0 %1249, %v353_v39  }
  0x23   :  { %1156 = vmatprep.mubr.bf16.mxu0 %v1261_v23  ;;  %1201 = vmatpush3.bf16.msra.mxu0 %v1398_v22 }
  0x24   :  { %1202 = vmatprep.subr.bf16.mxu0 %v1275_v30  ;;  %1183 = vmatpush3.bf16.msra.mxu1 %v1276_v44 }
  0x25   :  { %1232 = vmatprep.subr.bf16.mxu1 %v1398_v22 }
  0x27   :  { %1203 = vmatpush3.bf16.msra.mxu0 %v1275_v30  ;;  %1185 = vmatmul.mubr.bf16.vlgmr.msra.gmra.mxu1 %v1279_v46 }
  0x28   :  { %1204 = vmatprep.subr.bf16.mxu0 %v1277_v37  ;;  %1240 = vmatpush3.bf16.msra.mxu1 %v1398_v22 }
  0x29   :  { %1188 = vmatprep.mubr.bf16.mxu1 %v1282_v48  ;;  %1233 = vmatprep.subr.bf16.mxu1 %v1275_v30 }
  0x2a   :  { %1157 = vmatmul.mubr.bf16.gmra.mxu0 %v1262_v32 }
  0x2b   :  { %1160 = vmatprep.mubr.bf16.mxu0 %v1263_v35  ;;  %1205 = vmatpush3.bf16.msra.mxu0 %v1277_v37 }
  0x2c   :  { %1206 = vmatprep.subr.bf16.mxu0 %v1280_v41  ;;  %1241 = vmatpush3.bf16.msra.mxu1 %v1275_v30 }
  0x2d   :  { %1234 = vmatprep.subr.bf16.mxu1 %v1277_v37 }
  0x2f   :  { %1207 = vmatpush3.bf16.msra.mxu0 %v1280_v41  ;;  %1189 = vmatmul.mubr.bf16.gmra.mxu1 %v1283_v49 }
  0x30   :  { %1208 = vmatprep.subr.bf16.mxu0 %v1281_v45  ;;  %1242 = vmatpush3.bf16.msra.mxu1 %v1277_v37 }
  0x31   :  { %1235 = vmatprep.subr.bf16.mxu1 %v1280_v41  ;;  %1192 = vmatprep.mubr.bf16.mxu1 %v1286_v52 }
  0x32   :  { %1161 = vmatmul.mubr.bf16.gmra.mxu0 %v1264_v42 }
  0x33   :  { %1164 = vmatprep.mubr.bf16.mxu0 %v1265_v43  ;;  %1209 = vmatpush3.bf16.msra.mxu0 %v1281_v45 }
  0x34   :  { %1243 = vmatpush3.bf16.msra.mxu1 %v1280_v41  ;;  %1210 = vmatprep.subr.bf16.mxu0 %v1284_v50 }
  0x35   :  { %1236 = vmatprep.subr.bf16.mxu1 %v1281_v45 }
  0x37   :  { %1211 = vmatpush3.bf16.msra.mxu0 %v1284_v50  ;;  %1193 = vmatmul.mubr.bf16.gmra.mxu1 %v1287_v53 }
  0x38   :  { %1244 = vmatpush3.bf16.msra.mxu1 %v1281_v45  ;;  %1212 = vmatprep.subr.bf16.mxu0 %v1285_v51 }
  0x39   :  { %1237 = vmatprep.subr.bf16.mxu1 %v1284_v50  ;;  %1196 = vmatprep.mubr.bf16.mxu1 %v1289_v55 }
  0x3a   :  { %1165 = vmatmul.mubr.bf16.gmra.mxu0 %v1266_v47 }
  0x3b   :  { %1213 = vmatpush3.bf16.msra.mxu0 %v1285_v51 }
  0x3c   :  { %1245 = vmatpush3.bf16.msra.mxu1 %v1284_v50  ;;  %1214 = vmatprep.subr.bf16.mxu0 %v1288_v54 }
  0x3d   :  { %1238 = vmatprep.subr.bf16.mxu1 %v1285_v51 }
  0x3f   :  { %1215 = vmatpush3.bf16.msra.mxu0 %v1288_v54  ;;  %1197 = vmatmul.mubr.bf16.gmra.mxu1 %v1290_v56 }
  0x40   :  { %1246 = vmatpush3.bf16.msra.mxu1 %v1285_v51 }
  0x41   :  { %1239 = vmatprep.subr.bf16.mxu1 %v1288_v54 }
  0x44   :  { %1247 = vmatpush3.bf16.msra.mxu1 %v1288_v54 }
  0x80   :  { %v398_v57 = vpop.permute.xlu1 %397 }
  0x81   :  { %v358_v58 = vpop.permute.xlu0 %357 }
  0x84   :  { %v403_v59 = vpop.permute.xlu1 %402 }
  0x85   :  { %v363_v60 = vpop.permute.xlu0 %362 }
  0x88   :  { %v373_v61 = vpop.permute.xlu1 %372 }
  0x89   :  { %v368_v62 = vpop.permute.xlu0 %367 }
  0x8c   :  { %v413_v63 = vpop.permute.xlu1 %412 }
  0x8d   :  { %v408_v0 = vpop.permute.xlu0 %407 }
  0x90   :  { %v383_v2 = vpop.permute.xlu1 %382 }
  0x91   :  { %v378_v4 = vpop.permute.xlu0 %377 }
  0x94   :  { %v423_v8 = vpop.permute.xlu1 %422 }
  0x95   :  { %v418_v13 = vpop.permute.xlu0 %417 }
  0x98   :  { %v393_v18 = vpop.permute.xlu1 %392 }
  0x99   :  { %v388_v21 = vpop.permute.xlu0 %387 }
  0x9c   :  { %v433_v40 = vpop.permute.xlu1 %432 }
  0x9d   :  { %v428_v43 = vpop.permute.xlu0 %427 }
  0xe2   :  { %v1154_v1 = vpop.f32.mrf.mxu0 }
  0xe3   :  { %v437_v11 = vmul.f32 %v1154_v1, %v368_v62 }
  0xe4   :  { %v225_v3 = vpop.f32.mrf.mxu0 }
  0xe5   :  { %v435_v9 = vmul.f32 %v358_v58, %v225_v3 }
  0xe6   :  { %v1155_v5 = vpop.f32.mrf.mxu0 }
  0xe7   :  { %v438_v6 = vmul.f32 %v1155_v5, %v373_v61  ;;  %v1186_v49 = vpop.f32.mrf.mxu1 }
  0xe8   :  { %v228_v7 = vpop.f32.mrf.mxu0 }
  0xe9   :  { %v436_v10 = vmul.f32 %v363_v60, %v228_v7  ;;  %v452_v15 = vpack.c.bf16 %v438_v6, %v437_v11  ;;  %v637_v50 = vpop.f32.mrf.mxu1 }
  0xea   :  { %v1158_v12 = vpop.f32.mrf.mxu0 }
  0xeb   :  { %v451_v14 = vpack.c.bf16 %v436_v10, %v435_v9  ;;  %v441_v24 = vmul.f32 %v1158_v12, %v388_v21  ;;  %v1187_v51 = vpop.f32.mrf.mxu1 }
  0xec   :  { %v241_v16 = vpop.f32.mrf.mxu0 }
  0xed   :  { %1216 = vmatprep.mubr.bf16.mxu0 %v451_v14  ;;  %v439_v22 = vmul.f32 %v378_v4, %v241_v16  ;;  %v640_v52 = vpop.f32.mrf.mxu1 }
  0xee   :  { %v1159_v17 = vpop.f32.mrf.mxu0  ;;  %1217 = vmatmul.mubr.bf16.vlgmr.msra.gmra.mxu0 %v452_v15 }
  0xef   :  { %v442_v19 = vmul.f32 %v1159_v17, %v393_v18  ;;  %v1190_v53 = vpop.f32.mrf.mxu1 }
  0xf0   :  { %v244_v20 = vpop.f32.mrf.mxu0 }
  0xf1   :  { %v440_v23 = vmul.f32 %v383_v2, %v244_v20  ;;  %v454_v27 = vpack.c.bf16 %v442_v19, %v441_v24  ;;  %v653_v54 = vpop.f32.mrf.mxu1 }
  0xf2   :  { %v1162_v25 = vpop.f32.mrf.mxu0 }
  0xf3   :  { %v453_v26 = vpack.c.bf16 %v440_v23, %v439_v22  ;;  %v445_v34 = vmul.f32 %v1162_v25, %v408_v0  ;;  %v1191_v55 = vpop.f32.mrf.mxu1 }
  0xf4   :  { %v257_v28 = vpop.f32.mrf.mxu0 }
  0xf5   :  { %1220 = vmatprep.mubr.bf16.mxu0 %v453_v26  ;;  %v443_v32 = vmul.f32 %v398_v57, %v257_v28  ;;  %v656_v56 = vpop.f32.mrf.mxu1 }
  0xf6   :  { %v1163_v29 = vpop.f32.mrf.mxu0  ;;  %1221 = vmatmul.mubr.bf16.gmra.mxu0 %v454_v27 }
  0xf7   :  { %v446_v30 = vmul.f32 %v1163_v29, %v413_v63  ;;  %v1194_v57 = vpop.f32.mrf.mxu1  ;;  %v1509_v63 = vld [vmem:[%s1557_s6] ss:$0 sm:$0xff] }
  0xf8   :  { %v260_v31 = vpop.f32.mrf.mxu0 }
  0xf9   :  { %v444_v33 = vmul.f32 %v403_v59, %v260_v31  ;;  %v456_v37 = vpack.c.bf16 %v446_v30, %v445_v34  ;;  %v669_v58 = vpop.f32.mrf.mxu1 }
  0xfa   :  { %v1166_v35 = vpop.f32.mrf.mxu0 }
  0xfb   :  { %v455_v36 = vpack.c.bf16 %v444_v33, %v443_v32  ;;  %v449_v46 = vmul.f32 %v1166_v35, %v428_v43  ;;  %v1195_v59 = vpop.f32.mrf.mxu1 }
  0xfc   :  { %v273_v38 = vpop.f32.mrf.mxu0 }
  0xfd   :  { %1224 = vmatprep.mubr.bf16.mxu1 %v455_v36  ;;  %v447_v44 = vmul.f32 %v418_v13, %v273_v38  ;;  %v672_v60 = vpop.f32.mrf.mxu1 }
  0xfe   :  { %v1167_v39 = vpop.f32.mrf.mxu0  ;;  %1225 = vmatmul.mubr.bf16.vlgmr.msra.gmra.mxu1 %v456_v37 }
  0xff   :  { %v450_v41 = vmul.f32 %v1167_v39, %v433_v40  ;;  %v1198_v0 = vpop.f32.mrf.mxu1 }
 0x100   :  { %v276_v42 = vpop.f32.mrf.mxu0 }
 0x101   :  { %v448_v45 = vmul.f32 %v423_v8, %v276_v42  ;;  %v458_v48 = vpack.c.bf16 %v450_v41, %v449_v46  ;;  %v685_v6 = vpop.f32.mrf.mxu1 }
 0x103   :  { %v457_v47 = vpack.c.bf16 %v448_v45, %v447_v44  ;;  %v1199_v16 = vpop.f32.mrf.mxu1 }
 0x105   :  { %1228 = vmatprep.mubr.bf16.mxu1 %v457_v47  ;;  %v688_v26 = vpop.f32.mrf.mxu1 }
 0x106   :  { %1229 = vmatmul.mubr.bf16.gmra.mxu1 %v458_v48 }
 0x1ae   :  { %v1218_v61 = vpop.f32.mrf.mxu0 }
 0x1af   :  { %v791_v62 = vadd.f32 %v1218_v61, %v1186_v49 }
 0x1b0   :  { %v782_v1 = vpop.f32.mrf.mxu0 }
 0x1b1   :  { %v783_v2 = vadd.f32 %v782_v1, %v637_v50  ;;  %v854_v4 = vadd.f32 %v1509_v63, %v791_v62 }
 0x1b2   :  { %v1219_v3 = vpop.f32.mrf.mxu0 }
 0x1b3   :  { %v794_v5 = vadd.f32 %v1219_v3, %v1187_v51  ;;  %v852_v8 = vadd.f32 %v1509_v63, %v783_v2  ;;  %v870_v12 = vmax.f32 %v854_v4, 0.0 }
 0x1b4   :  { %v785_v7 = vpop.f32.mrf.mxu0 }
 0x1b5   :  { %v855_v9 = vadd.f32 %v1509_v63, %v794_v5  ;;  %v786_v10 = vadd.f32 %v785_v7, %v640_v52  ;;  %v868_v18 = vmax.f32 %v852_v8, 0.0 }
 0x1b6   :  { %v1222_v11 = vpop.f32.mrf.mxu0 }
 0x1b7   :  { %v871_v13 = vmax.f32 %v855_v9, 0.0  ;;  %v853_v14 = vadd.f32 %v1509_v63, %v786_v10  ;;  %v807_v15 = vadd.f32 %v1222_v11, %v1190_v53 }
 0x1b8   :  { %v798_v17 = vpop.f32.mrf.mxu0 }
 0x1b9   :  { %v1049_v19 = vpack.c.bf16 %v871_v13, %v870_v12  ;;  %v869_v20 = vmax.f32 %v853_v14, 0.0  ;;  %v799_v21 = vadd.f32 %v798_v17, %v653_v54  ;;  %v858_v24 = vadd.f32 %v1509_v63, %v807_v15 }
 0x1ba   :  { %v1223_v22 = vpop.f32.mrf.mxu0 }
 0x1bb   :  { %1081 = vst [vmem:[%s1558_s7 + $0x8] sm:$0xff] %v1049_v19   ;;  %v1044_v23 = vpack.c.bf16 %v869_v20, %v868_v18  ;;  %v810_v25 = vadd.f32 %v1223_v22, %v1191_v55  ;;  %v856_v28 = vadd.f32 %v1509_v63, %v799_v21  ;;  %v874_v32 = vmax.f32 %v858_v24, 0.0 }
 0x1bc   :  { %v801_v27 = vpop.f32.mrf.mxu0 }
 0x1bd   :  { %1045 = vst [vmem:[%s1558_s7] sm:$0xff] %v1044_v23   ;;  %v859_v29 = vadd.f32 %v1509_v63, %v810_v25  ;;  %v802_v30 = vadd.f32 %v801_v27, %v656_v56  ;;  %v872_v37 = vmax.f32 %v856_v28, 0.0 }
 0x1be   :  { %v1226_v31 = vpop.f32.mrf.mxu1 }
 0x1bf   :  { %v875_v33 = vmax.f32 %v859_v29, 0.0  ;;  %v857_v34 = vadd.f32 %v1509_v63, %v802_v30  ;;  %v823_v35 = vadd.f32 %v1226_v31, %v1194_v57 }
 0x1c0   :  { %v814_v36 = vpop.f32.mrf.mxu1 }
 0x1c1   :  { %v1059_v38 = vpack.c.bf16 %v875_v33, %v874_v32  ;;  %v873_v39 = vmax.f32 %v857_v34, 0.0  ;;  %v815_v40 = vadd.f32 %v814_v36, %v669_v58  ;;  %v862_v43 = vadd.f32 %v1509_v63, %v823_v35 }
 0x1c2   :  { %v1227_v41 = vpop.f32.mrf.mxu1 }
 0x1c3   :  { %1083 = vst [vmem:[%s1558_s7 + $0x18] sm:$0xff] %v1059_v38   ;;  %v1054_v42 = vpack.c.bf16 %v873_v39, %v872_v37  ;;  %v826_v44 = vadd.f32 %v1227_v41, %v1195_v59  ;;  %v860_v46 = vadd.f32 %v1509_v63, %v815_v40  ;;  %v878_v50 = vmax.f32 %v862_v43, 0.0 }
 0x1c4   :  { %v817_v45 = vpop.f32.mrf.mxu1 }
 0x1c5   :  { %1082 = vst [vmem:[%s1558_s7 + $0x10] sm:$0xff] %v1054_v42   ;;  %v863_v47 = vadd.f32 %v1509_v63, %v826_v44  ;;  %v818_v48 = vadd.f32 %v817_v45, %v672_v60  ;;  %v876_v55 = vmax.f32 %v860_v46, 0.0 }
 0x1c6   :  { %v1230_v49 = vpop.f32.mrf.mxu1 }
 0x1c7   :  { %v879_v51 = vmax.f32 %v863_v47, 0.0  ;;  %v861_v52 = vadd.f32 %v1509_v63, %v818_v48  ;;  %v839_v53 = vadd.f32 %v1230_v49, %v1198_v0 }
 0x1c8   :  { %v830_v54 = vpop.f32.mrf.mxu1 }
 0x1c9   :  { %v1069_v56 = vpack.c.bf16 %v879_v51, %v878_v50  ;;  %v877_v57 = vmax.f32 %v861_v52, 0.0  ;;  %v831_v58 = vadd.f32 %v830_v54, %v685_v6  ;;  %v866_v62 = vadd.f32 %v1509_v63, %v839_v53 }
 0x1ca   :  { %v1231_v59 = vpop.f32.mrf.mxu1 }
 0x1cb   :  { %1085 = vst [vmem:[%s1558_s7 + $0x28] sm:$0xff] %v1069_v56   ;;  %v1064_v61 = vpack.c.bf16 %v877_v57, %v876_v55  ;;  %v842_v60 = vadd.f32 %v1231_v59, %v1199_v16  ;;  %v864_v0 = vadd.f32 %v1509_v63, %v831_v58  ;;  %v882_v4 = vmax.f32 %v866_v62, 0.0 }
 0x1cc   :  { %v833_v1 = vpop.f32.mrf.mxu1 }
 0x1cd   :  { %1084 = vst [vmem:[%s1558_s7 + $0x20] sm:$0xff] %v1064_v61   ;;  %v867_v2 = vadd.f32 %v1509_v63, %v842_v60  ;;  %v834_v3 = vadd.f32 %v833_v1, %v688_v26  ;;  %v880_v7 = vmax.f32 %v864_v0, 0.0 }
 0x1cf   :  { %v883_v5 = vmax.f32 %v867_v2, 0.0  ;;  %v865_v6 = vadd.f32 %v1509_v63, %v834_v3 }
 0x1d1   :  { %v1079_v8 = vpack.c.bf16 %v883_v5, %v882_v4  ;;  %v881_v9 = vmax.f32 %v865_v6, 0.0 }
 0x1d3   :  { %1087 = vst [vmem:[%s1558_s7 + $0x38] sm:$0xff] %v1079_v8   ;;  %v1074_v10 = vpack.c.bf16 %v881_v9, %v880_v7 }
 0x1d5   :  { %1086 = vst [vmem:[%s1558_s7 + $0x30] sm:$0xff] %v1074_v10  }

// kernel: gqnn_forward.3
= control target key start
LH: loop header
LB: loop body
LE: loop exit
PB: predicated region body
PF: predicated region fallthrough
CT: control target
= control target key end

     0   :  { %v1671_v1 = vmov 0   ;;  %s1672_s22 = smov 64   ;;  %s2246_s1 = inlined_call_operand.vmem [shape: bf16[128,128], index: 1, kind: input, shape index: {}, may-alias: {1,2}]   ;;  %s2247_s0 = inlined_call_operand.vmem [shape: bf16[128,128], index: 0, kind: input, shape index: {}]   ;;  %s2248_s3 = inlined_call_operand.vmem [shape: f32[128,1], index: 3, kind: input, shape index: {}]   ;;  %s2249_s5 = inlined_call_operand.vmem [shape: bf16[128,128], index: 5, kind: input, shape index: {}]   ;;  %s2250_s4 = inlined_call_operand.vmem [shape: bf16[128,128], index: 4, kind: input, shape index: {}]   ;;  %s2251_s2 = inlined_call_operand.vmem [shape: bf16[128,128], index: 2, kind: input, shape index: {}, may-alias: {1,2}]   ;;  %s2252_s7 = inlined_call_operand.vmem [shape: bf16[128,128], index: 7, kind: input, shape index: {}]   ;;  %s2253_s6 = inlined_call_operand.vmem [shape: f32[1,128], index: 6, kind: input, shape index: {}]   ;;  %s2254_s8 = inlined_call_operand.vmem [shape: f32[1,128], index: 8, kind: input, shape index: {}]   ;;  %s2255_s9 = inlined_call_operand.vmem [shape: f32[128,128], index: 9, kind: output, shape index: {}]  }
   0x1   :  { %v1559_v0 = vld [vmem:[%s2246_s1 + $0x38] sm:$0xff]   ;;  %1557 = vset.pattern.permute.xlu0 %v1671_v1  ;;  %1558 = vset.pattern.permute.xlu1 %v1671_v1  ;;  %v1560_v2 = vld [vmem:[%s2246_s1 + $0x30] sm:$0xff]   ;;  %v1561_v3 = vld [vmem:[%s2246_s1 + $0x28] sm:$0xff]  }
   0x2   :  { %1427 = vmatprep.subr.bf16.mxu0 %v1559_v0  ;;  %v1562_v4 = vld [vmem:[%s2246_s1 + $0x20] sm:$0xff]   ;;  %v1563_v6 = vld [vmem:[%s2246_s1 + $0x18] sm:$0xff]   ;;  %v1564_v7 = vld [vmem:[%s2246_s1 + $0x10] sm:$0xff]  }
   0x3   :  { %1428 = vmatpush3.bf16.msra.mxu0 %v1559_v0  ;;  %v1567_v5 = vld [vmem:[%s2247_s0] sm:$0xff]   ;;  %v347_v9 = vld [vmem:[%s2248_s3 + $0x10] sm:$0xff]  ;;  %v346_v10 = vld [vmem:[%s2248_s3 + $0x8] sm:$0xff] }
   0x4   :  { %1429 = vmatprep.subr.bf16.mxu0 %v1560_v2  ;;  %1443 = vmatprep.mubr.bf16.mxu0 %v1567_v5  ;;  %v345_v8 = vld [vmem:[%s2248_s3] sm:$0xff]  ;;  %v348_v11 = vld [vmem:[%s2248_s3 + $0x18] sm:$0xff]  ;;  %v1565_v12 = vld [vmem:[%s2246_s1 + $0x8] sm:$0xff]  }
   0x5   :  { %363 = vperm.xlu0 %1557, %v345_v8   ;;  %373 = vperm.xlu1 %1558, %v347_v9   ;;  %v349_v13 = vld [vmem:[%s2248_s3 + $0x20] sm:$0xff]  ;;  %v350_v14 = vld [vmem:[%s2248_s3 + $0x28] sm:$0xff]  ;;  %v1575_v15 = vld [vmem:[%s2249_s5 + $0x38] sm:$0xff]  }
   0x6   :  { %v1576_v16 = vld [vmem:[%s2249_s5 + $0x30] sm:$0xff]   ;;  %v1566_v17 = vld [vmem:[%s2246_s1] sm:$0xff]   ;;  %1459 = vmatprep.subr.bf16.mxu1 %v1575_v15  ;;  %v352_v19 = vld [vmem:[%s2248_s3 + $0x38] sm:$0xff] }
   0x7   :  { %1430 = vmatpush3.bf16.msra.mxu0 %v1560_v2  ;;  %v351_v18 = vld [vmem:[%s2248_s3 + $0x30] sm:$0xff]  ;;  %1460 = vmatpush3.bf16.msra.mxu1 %v1575_v15  ;;  %v1578_v20 = vld [vmem:[%s2249_s5 + $0x28] sm:$0xff]   ;;  %v1577_v22 = vld [vmem:[%s2250_s4 + $0x38] sm:$0xff]  }
   0x8   :  { %1431 = vmatprep.subr.bf16.mxu0 %v1561_v3  ;;  %1461 = vmatprep.subr.bf16.mxu1 %v1576_v16  ;;  %v1568_v21 = vld [vmem:[%s2247_s0 + $0x8] sm:$0xff]   ;;  %v1569_v23 = vld [vmem:[%s2247_s0 + $0x10] sm:$0xff]   ;;  %v353_v24 = vld [vmem:[%s2248_s3 + $0x40] sm:$0xff] }
   0x9   :  { %368 = vperm.xlu0 %1557, %v346_v10   ;;  %378 = vperm.xlu1 %1558, %v348_v11   ;;  %v354_v25 = vld [vmem:[%s2248_s3 + $0x48] sm:$0xff]  ;;  %v1579_v26 = vld [vmem:[%s2250_s4 + $0x30] sm:$0xff]   ;;  %v356_v28 = vld [vmem:[%s2248_s3 + $0x58] sm:$0xff] }
   0xa   :  { %v355_v27 = vld [vmem:[%s2248_s3 + $0x50] sm:$0xff]  ;;  %v1580_v29 = vld [vmem:[%s2249_s5 + $0x20] sm:$0xff]   ;;  %v1582_v30 = vld [vmem:[%s2249_s5 + $0x18] sm:$0xff]  }
   0xb   :  { %1432 = vmatpush3.bf16.msra.mxu0 %v1561_v3  ;;  %1462 = vmatpush3.bf16.msra.mxu1 %v1576_v16  ;;  %v1581_v31 = vld [vmem:[%s2250_s4 + $0x28] sm:$0xff]   ;;  %v1570_v32 = vld [vmem:[%s2247_s0 + $0x18] sm:$0xff]   ;;  %v357_v33 = vld [vmem:[%s2248_s3 + $0x60] sm:$0xff] }
   0xc   :  { %1433 = vmatprep.subr.bf16.mxu0 %v1562_v4  ;;  %1463 = vmatprep.subr.bf16.mxu1 %v1578_v20  ;;  %v358_v34 = vld [vmem:[%s2248_s3 + $0x68] sm:$0xff]  ;;  %v1571_v35 = vld [vmem:[%s2247_s0 + $0x20] sm:$0xff]   ;;  %v1584_v37 = vld [vmem:[%s2249_s5 + $0x10] sm:$0xff]  }
   0xd   :  { %383 = vperm.xlu0 %1557, %v349_v13   ;;  %388 = vperm.xlu1 %1558, %v350_v14   ;;  %v1583_v36 = vld [vmem:[%s2250_s4 + $0x20] sm:$0xff]   ;;  %v359_v38 = vld [vmem:[%s2248_s3 + $0x70] sm:$0xff]  ;;  %v360_v39 = vld [vmem:[%s2248_s3 + $0x78] sm:$0xff] }
   0xe   :  { %v1586_v40 = vld [vmem:[%s2249_s5 + $0x8] sm:$0xff]   ;;  %v1585_v41 = vld [vmem:[%s2250_s4 + $0x18] sm:$0xff]   ;;  %v1573_v43 = vld [vmem:[%s2247_s0 + $0x30] sm:$0xff]  }
   0xf   :  { %1434 = vmatpush3.bf16.msra.mxu0 %v1562_v4  ;;  %1464 = vmatpush3.bf16.msra.mxu1 %v1578_v20  ;;  %v1572_v42 = vld [vmem:[%s2247_s0 + $0x28] sm:$0xff]   ;;  %v1587_v44 = vld [vmem:[%s2250_s4 + $0x10] sm:$0xff]   ;;  %v1574_v45 = vld [vmem:[%s2247_s0 + $0x38] sm:$0xff]  }
  0x10   :  { %1435 = vmatprep.subr.bf16.mxu0 %v1563_v6  ;;  %1465 = vmatprep.subr.bf16.mxu1 %v1580_v29  ;;  %v1588_v46 = vld [vmem:[%s2249_s5] sm:$0xff]   ;;  %v1589_v47 = vld [vmem:[%s2250_s4 + $0x8] sm:$0xff]   ;;  %v1593_v51 = vld [vmem:[%s2251_s2 + $0x10] sm:$0xff]  }
  0x11   :  { %393 = vperm.xlu0 %1557, %v351_v18   ;;  %398 = vperm.xlu1 %1558, %v352_v19   ;;  %v1590_v48 = vld [vmem:[%s2251_s2] sm:$0xff]   ;;  %v1591_v49 = vld [vmem:[%s2251_s2 + $0x8] sm:$0xff]   ;;  %v1594_v52 = vld [vmem:[%s2251_s2 + $0x18] sm:$0xff]  }
  0x12   :  { %1475 = vmatprep.mubr.bf16.mxu1 %v1590_v48  ;;  %v1592_v50 = vld [vmem:[%s2250_s4] sm:$0xff]   ;;  %v1596_v54 = vld [vmem:[%s2251_s2 + $0x28] sm:$0xff]   ;;  %v1597_v55 = vld [vmem:[%s2251_s2 + $0x30] sm:$0xff]  }
  0x13   :  { %1436 = vmatpush3.bf16.msra.mxu0 %v1563_v6  ;;  %1466 = vmatpush3.bf16.msra.mxu1 %v1580_v29  ;;  %v1595_v53 = vld [vmem:[%s2251_s2 + $0x20] sm:$0xff]   ;;  %v1598_v56 = vld [vmem:[%s2251_s2 + $0x38] sm:$0xff]   ;;  %v1600_v58 = vld [vmem:[%s2252_s7 + $0x30] sm:$0xff]  }
  0x14   :  { %1437 = vmatprep.subr.bf16.mxu0 %v1564_v7  ;;  %1467 = vmatprep.subr.bf16.mxu1 %v1582_v30  ;;  %v1599_v57 = vld [vmem:[%s2252_s7 + $0x38] sm:$0xff]   ;;  %v1601_v59 = vld [vmem:[%s2252_s7 + $0x28] sm:$0xff]   ;;  %v1602_v60 = vld [vmem:[%s2252_s7 + $0x20] sm:$0xff]  }
  0x15   :  { %403 = vperm.xlu0 %1557, %v353_v24   ;;  %408 = vperm.xlu1 %1558, %v354_v25   ;;  %v1603_v61 = vld [vmem:[%s2252_s7 + $0x18] sm:$0xff]  }
  0x17   :  { %1438 = vmatpush3.bf16.msra.mxu0 %v1564_v7  ;;  %1468 = vmatpush3.bf16.msra.mxu1 %v1582_v30 }
  0x18   :  { %1439 = vmatprep.subr.bf16.mxu0 %v1565_v12  ;;  %1469 = vmatprep.subr.bf16.mxu1 %v1584_v37 }
  0x19   :  { %413 = vperm.xlu0 %1557, %v355_v27   ;;  %418 = vperm.xlu1 %1558, %v356_v28  }
  0x1b   :  { %1440 = vmatpush3.bf16.msra.mxu0 %v1565_v12  ;;  %1470 = vmatpush3.bf16.msra.mxu1 %v1584_v37 }
  0x1c   :  { %1441 = vmatprep.subr.bf16.mxu0 %v1566_v17  ;;  %1471 = vmatprep.subr.bf16.mxu1 %v1586_v40 }
  0x1d   :  { %423 = vperm.xlu0 %1557, %v357_v33   ;;  %428 = vperm.xlu1 %1558, %v358_v34  }
  0x1f   :  { %1442 = vmatpush3.bf16.msra.mxu0 %v1566_v17  ;;  %1472 = vmatpush3.bf16.msra.mxu1 %v1586_v40 }
  0x20   :  { %1491 = vmatprep.subr.bf16.mxu0 %v1577_v22  ;;  %1473 = vmatprep.subr.bf16.mxu1 %v1588_v46 }
  0x21   :  { %433 = vperm.xlu0 %1557, %v359_v38   ;;  %438 = vperm.xlu1 %1558, %v360_v39  }
  0x22   :  { %1444 = vmatmul.mubr.bf16.vlgmr.msra.gmra.mxu0 %v1568_v21 }
  0x23   :  { %1447 = vmatprep.mubr.bf16.mxu0 %v1569_v23  ;;  %1492 = vmatpush3.bf16.msra.mxu0 %v1577_v22 }
  0x24   :  { %1493 = vmatprep.subr.bf16.mxu0 %v1579_v26  ;;  %1474 = vmatpush3.bf16.msra.mxu1 %v1588_v46 }
  0x25   :  { %1523 = vmatprep.subr.bf16.mxu1 %v1599_v57 }
  0x27   :  { %1494 = vmatpush3.bf16.msra.mxu0 %v1579_v26  ;;  %1476 = vmatmul.mubr.bf16.vlgmr.msra.gmra.mxu1 %v1591_v49 }
  0x28   :  { %1495 = vmatprep.subr.bf16.mxu0 %v1581_v31  ;;  %1479 = vmatprep.mubr.bf16.mxu1 %v1593_v51 }
  0x29   :  { %1524 = vmatpush3.bf16.msra.mxu1 %v1599_v57 }
  0x2a   :  { %1448 = vmatmul.mubr.bf16.gmra.mxu0 %v1570_v32  ;;  %1525 = vmatprep.subr.bf16.mxu1 %v1600_v58 }
  0x2b   :  { %1451 = vmatprep.mubr.bf16.mxu0 %v1571_v35  ;;  %1496 = vmatpush3.bf16.msra.mxu0 %v1581_v31 }
  0x2c   :  { %1497 = vmatprep.subr.bf16.mxu0 %v1583_v36 }
  0x2d   :  { %1526 = vmatpush3.bf16.msra.mxu1 %v1600_v58 }
  0x2e   :  { %1527 = vmatprep.subr.bf16.mxu1 %v1601_v59 }
  0x2f   :  { %1498 = vmatpush3.bf16.msra.mxu0 %v1583_v36  ;;  %1480 = vmatmul.mubr.bf16.gmra.mxu1 %v1594_v52 }
  0x30   :  { %1499 = vmatprep.subr.bf16.mxu0 %v1585_v41  ;;  %1483 = vmatprep.mubr.bf16.mxu1 %v1595_v53 }
  0x31   :  { %1528 = vmatpush3.bf16.msra.mxu1 %v1601_v59 }
  0x32   :  { %1452 = vmatmul.mubr.bf16.gmra.mxu0 %v1572_v42  ;;  %1529 = vmatprep.subr.bf16.mxu1 %v1602_v60 }
  0x33   :  { %1455 = vmatprep.mubr.bf16.mxu0 %v1573_v43  ;;  %1500 = vmatpush3.bf16.msra.mxu0 %v1585_v41 }
  0x34   :  { %1501 = vmatprep.subr.bf16.mxu0 %v1587_v44 }
  0x35   :  { %1530 = vmatpush3.bf16.msra.mxu1 %v1602_v60 }
  0x36   :  { %1531 = vmatprep.subr.bf16.mxu1 %v1603_v61 }
  0x37   :  { %1502 = vmatpush3.bf16.msra.mxu0 %v1587_v44  ;;  %1484 = vmatmul.mubr.bf16.gmra.mxu1 %v1596_v54  ;;  %v1604_v54 = vld [vmem:[%s2252_s7 + $0x10] sm:$0xff]  }
  0x38   :  { %1503 = vmatprep.subr.bf16.mxu0 %v1589_v47  ;;  %1487 = vmatprep.mubr.bf16.mxu1 %v1597_v55  ;;  %v1605_v55 = vld [vmem:[%s2252_s7 + $0x8] sm:$0xff]  }
  0x39   :  { %1532 = vmatpush3.bf16.msra.mxu1 %v1603_v61 }
  0x3a   :  { %1456 = vmatmul.mubr.bf16.gmra.mxu0 %v1574_v45  ;;  %1533 = vmatprep.subr.bf16.mxu1 %v1604_v54 }
  0x3b   :  { %1504 = vmatpush3.bf16.msra.mxu0 %v1589_v47 }
  0x3c   :  { %1505 = vmatprep.subr.bf16.mxu0 %v1592_v50 }
  0x3d   :  { %1534 = vmatpush3.bf16.msra.mxu1 %v1604_v54 }
  0x3e   :  { %1535 = vmatprep.subr.bf16.mxu1 %v1605_v55 }
  0x3f   :  { %1506 = vmatpush3.bf16.msra.mxu0 %v1592_v50  ;;  %1488 = vmatmul.mubr.bf16.gmra.mxu1 %v1598_v56  ;;  %v1606_v56 = vld [vmem:[%s2252_s7] sm:$0xff]  }
  0x41   :  { %1536 = vmatpush3.bf16.msra.mxu1 %v1605_v55 }
  0x42   :  { %1537 = vmatprep.subr.bf16.mxu1 %v1606_v56 }
  0x45   :  { %1538 = vmatpush3.bf16.msra.mxu1 %v1606_v56 }
  0x80   :  { %v374_v62 = vpop.permute.xlu1 %373  ;;  %v364_v63 = vpop.permute.xlu0 %363 }
  0x84   :  { %v379_v0 = vpop.permute.xlu1 %378  ;;  %v369_v1 = vpop.permute.xlu0 %368 }
  0x88   :  { %v389_v2 = vpop.permute.xlu1 %388  ;;  %v384_v4 = vpop.permute.xlu0 %383 }
  0x8c   :  { %v399_v7 = vpop.permute.xlu1 %398  ;;  %v394_v10 = vpop.permute.xlu0 %393 }
  0x90   :  { %v409_v18 = vpop.permute.xlu1 %408  ;;  %v404_v20 = vpop.permute.xlu0 %403 }
  0x94   :  { %v419_v27 = vpop.permute.xlu1 %418  ;;  %v414_v31 = vpop.permute.xlu0 %413 }
  0x98   :  { %v429_v35 = vpop.permute.xlu1 %428  ;;  %v424_v40 = vpop.permute.xlu0 %423 }
  0x9c   :  { %v439_v45 = vpop.permute.xlu1 %438  ;;  %v434_v48 = vpop.permute.xlu0 %433 }
  0xe2   :  { %v1445_v3 = vpop.f32.mrf.mxu0 }
  0xe3   :  { %v443_v13 = vmul.f32 %v1445_v3, %v374_v62 }
  0xe4   :  { %v231_v5 = vpop.f32.mrf.mxu0 }
  0xe5   :  { %v441_v11 = vmul.f32 %v364_v63, %v231_v5 }
  0xe6   :  { %v1446_v6 = vpop.f32.mrf.mxu0 }
  0xe7   :  { %v444_v8 = vmul.f32 %v1446_v6, %v379_v0  ;;  %v1477_v57 = vpop.f32.mrf.mxu1 }
  0xe8   :  { %v234_v9 = vpop.f32.mrf.mxu0 }
  0xe9   :  { %v442_v12 = vmul.f32 %v369_v1, %v234_v9  ;;  %v458_v16 = vpack.c.bf16 %v444_v8, %v443_v13  ;;  %v643_v58 = vpop.f32.mrf.mxu1 }
  0xea   :  { %v1449_v14 = vpop.f32.mrf.mxu0 }
  0xeb   :  { %v457_v15 = vpack.c.bf16 %v442_v12, %v441_v11  ;;  %v447_v25 = vmul.f32 %v1449_v14, %v394_v10  ;;  %v1478_v59 = vpop.f32.mrf.mxu1 }
  0xec   :  { %v247_v17 = vpop.f32.mrf.mxu0 }
  0xed   :  { %1507 = vmatprep.mubr.bf16.mxu0 %v457_v15  ;;  %v445_v23 = vmul.f32 %v384_v4, %v247_v17  ;;  %v646_v60 = vpop.f32.mrf.mxu1 }
  0xee   :  { %v1450_v19 = vpop.f32.mrf.mxu0  ;;  %1508 = vmatmul.mubr.bf16.vlgmr.msra.gmra.mxu0 %v458_v16 }
  0xef   :  { %v448_v21 = vmul.f32 %v1450_v19, %v399_v7  ;;  %v1481_v61 = vpop.f32.mrf.mxu1  ;;  %v1918_v7 = vld [vmem:[%s2253_s6] ss:$0 sm:$0xff] }
  0xf0   :  { %v250_v22 = vpop.f32.mrf.mxu0 }
  0xf1   :  { %v446_v24 = vmul.f32 %v389_v2, %v250_v22  ;;  %v460_v29 = vpack.c.bf16 %v448_v21, %v447_v25  ;;  %v659_v62 = vpop.f32.mrf.mxu1 }
  0xf2   :  { %v1453_v26 = vpop.f32.mrf.mxu0 }
  0xf3   :  { %v459_v28 = vpack.c.bf16 %v446_v24, %v445_v23  ;;  %v451_v38 = vmul.f32 %v1453_v26, %v414_v31  ;;  %v1482_v63 = vpop.f32.mrf.mxu1 }
  0xf4   :  { %v263_v30 = vpop.f32.mrf.mxu0 }
  0xf5   :  { %1511 = vmatprep.mubr.bf16.mxu0 %v459_v28  ;;  %v449_v36 = vmul.f32 %v404_v20, %v263_v30  ;;  %v662_v0 = vpop.f32.mrf.mxu1 }
  0xf6   :  { %v1454_v32 = vpop.f32.mrf.mxu0  ;;  %1512 = vmatmul.mubr.bf16.gmra.mxu0 %v460_v29 }
  0xf7   :  { %v452_v33 = vmul.f32 %v1454_v32, %v419_v27  ;;  %v1485_v3 = vpop.f32.mrf.mxu1 }
  0xf8   :  { %v266_v34 = vpop.f32.mrf.mxu0 }
  0xf9   :  { %v450_v37 = vmul.f32 %v409_v18, %v266_v34  ;;  %v462_v42 = vpack.c.bf16 %v452_v33, %v451_v38  ;;  %v675_v10 = vpop.f32.mrf.mxu1 }
  0xfa   :  { %v1457_v39 = vpop.f32.mrf.mxu0 }
  0xfb   :  { %v461_v41 = vpack.c.bf16 %v450_v37, %v449_v36  ;;  %v455_v51 = vmul.f32 %v1457_v39, %v434_v48  ;;  %v1486_v19 = vpop.f32.mrf.mxu1 }
  0xfc   :  { %v279_v43 = vpop.f32.mrf.mxu0 }
  0xfd   :  { %1515 = vmatprep.mubr.bf16.mxu0 %v461_v41  ;;  %v453_v49 = vmul.f32 %v424_v40, %v279_v43  ;;  %v678_v30 = vpop.f32.mrf.mxu1 }
  0xfe   :  { %v1458_v44 = vpop.f32.mrf.mxu0  ;;  %1516 = vmatmul.mubr.bf16.gmra.mxu0 %v462_v42 }
  0xff   :  { %v456_v46 = vmul.f32 %v1458_v44, %v439_v45  ;;  %v1489_v38 = vpop.f32.mrf.mxu1 }
 0x100   :  { %v282_v47 = vpop.f32.mrf.mxu0 }
 0x101   :  { %v454_v50 = vmul.f32 %v429_v35, %v282_v47  ;;  %v464_v53 = vpack.c.bf16 %v456_v46, %v455_v51  ;;  %v691_v48 = vpop.f32.mrf.mxu1 }
 0x103   :  { %v463_v52 = vpack.c.bf16 %v454_v50, %v453_v49 }
 0x105   :  { %1519 = vmatprep.mubr.bf16.mxu0 %v463_v52 }
 0x106   :  { %1520 = vmatmul.mubr.bf16.gmra.mxu0 %v464_v53 }
 0x1ae   :  { %v1509_v1 = vpop.f32.mrf.mxu0 }
 0x1af   :  { %v797_v5 = vadd.f32 %v1509_v1, %v1477_v57 }
 0x1b0   :  { %v788_v2 = vpop.f32.mrf.mxu0 }
 0x1b1   :  { %v789_v4 = vadd.f32 %v788_v2, %v643_v58  ;;  %v860_v14 = vadd.f32 %v1918_v7, %v797_v5  ;;  %v1490_v58 = vpop.f32.mrf.mxu1 }
 0x1b2   :  { %v1510_v6 = vpop.f32.mrf.mxu0 }
 0x1b3   :  { %v800_v8 = vadd.f32 %v1510_v6, %v1478_v59  ;;  %v858_v11 = vadd.f32 %v1918_v7, %v789_v4  ;;  %v876_v23 = vmax.f32 %v860_v14, 0.0  ;;  %v694_v4 = vpop.f32.mrf.mxu1 }
 0x1b4   :  { %v791_v9 = vpop.f32.mrf.mxu0 }
 0x1b5   :  { %v861_v12 = vadd.f32 %v1918_v7, %v800_v8  ;;  %v792_v13 = vadd.f32 %v791_v9, %v646_v60  ;;  %v874_v20 = vmax.f32 %v858_v11, 0.0 }
 0x1b6   :  { %v1513_v15 = vpop.f32.mrf.mxu0 }
 0x1b7   :  { %v859_v16 = vadd.f32 %v1918_v7, %v792_v13  ;;  %v877_v17 = vmax.f32 %v861_v12, 0.0  ;;  %v813_v24 = vadd.f32 %v1513_v15, %v1481_v61 }
 0x1b8   :  { %v804_v18 = vpop.f32.mrf.mxu0 }
 0x1b9   :  { %v875_v21 = vmax.f32 %v859_v16, 0.0  ;;  %v805_v22 = vadd.f32 %v804_v18, %v659_v62  ;;  %v891_v28 = vpack.c.bf16 %v877_v17, %v876_v23  ;;  %v864_v34 = vadd.f32 %v1918_v7, %v813_v24 }
 0x1ba   :  { %v1514_v25 = vpop.f32.mrf.mxu0 }
 0x1bb   :  { %v816_v26 = vadd.f32 %v1514_v25, %v1482_v63  ;;  %v890_v27 = vpack.c.bf16 %v875_v21, %v874_v20  ;;  %v862_v31 = vadd.f32 %v1918_v7, %v805_v22  ;;  %v880_v43 = vmax.f32 %v864_v34, 0.0 }
 0x1bc   :  { %v807_v29 = vpop.f32.mrf.mxu0 }
 0x1bd   :  { %v865_v32 = vadd.f32 %v1918_v7, %v816_v26  ;;  %v808_v33 = vadd.f32 %v807_v29, %v662_v0  ;;  %1539 = vmatprep.mubr.bf16.mxu1 %v890_v27  ;;  %v878_v40 = vmax.f32 %v862_v31, 0.0 }
 0x1be   :  { %v1517_v35 = vpop.f32.mrf.mxu0  ;;  %1540 = vmatmul.mubr.bf16.vlgmr.msra.gmra.mxu1 %v891_v28 }
 0x1bf   :  { %v863_v36 = vadd.f32 %v1918_v7, %v808_v33  ;;  %v881_v37 = vmax.f32 %v865_v32, 0.0  ;;  %v829_v44 = vadd.f32 %v1517_v35, %v1485_v3 }
 0x1c0   :  { %v820_v39 = vpop.f32.mrf.mxu0 }
 0x1c1   :  { %v879_v41 = vmax.f32 %v863_v36, 0.0  ;;  %v821_v42 = vadd.f32 %v820_v39, %v675_v10  ;;  %v893_v50 = vpack.c.bf16 %v881_v37, %v880_v43  ;;  %v868_v54 = vadd.f32 %v1918_v7, %v829_v44 }
 0x1c2   :  { %v1518_v45 = vpop.f32.mrf.mxu0 }
 0x1c3   :  { %v832_v46 = vadd.f32 %v1518_v45, %v1486_v19  ;;  %v892_v47 = vpack.c.bf16 %v879_v41, %v878_v40  ;;  %v866_v51 = vadd.f32 %v1918_v7, %v821_v42  ;;  %v884_v63 = vmax.f32 %v868_v54, 0.0  ;;  %v1338_v19 = vld [vmem:[%s2254_s8] ss:$0 sm:$0xff] }
 0x1c4   :  { %v823_v49 = vpop.f32.mrf.mxu0 }
 0x1c5   :  { %v869_v52 = vadd.f32 %v1918_v7, %v832_v46  ;;  %v824_v53 = vadd.f32 %v823_v49, %v678_v30  ;;  %1543 = vmatprep.mubr.bf16.mxu1 %v892_v47  ;;  %v882_v60 = vmax.f32 %v866_v51, 0.0  ;;  %v1098_v51 = vlaneseq }
 0x1c6   :  { %v1521_v55 = vpop.f32.mrf.mxu0  ;;  %1544 = vmatmul.mubr.bf16.gmra.mxu1 %v893_v50 }
 0x1c7   :  { %v867_v56 = vadd.f32 %v1918_v7, %v824_v53  ;;  %v885_v57 = vmax.f32 %v869_v52, 0.0  ;;  %v845_v0 = vadd.f32 %v1521_v55, %v1489_v38  ;;  %v2003_v52 = vand.u32 127, %v1098_v51 }
 0x1c8   :  { %v836_v59 = vpop.f32.mrf.mxu0 }
 0x1c9   :  { %v883_v61 = vmax.f32 %v867_v56, 0.0  ;;  %v837_v62 = vadd.f32 %v836_v59, %v691_v48  ;;  %v895_v6 = vpack.c.bf16 %v885_v57, %v884_v63  ;;  %v872_v11 = vadd.f32 %v1918_v7, %v845_v0 }
 0x1ca   :  { %v1522_v1 = vpop.f32.mrf.mxu0  ;;  %vm1100_vm0 = vcmp.lt.s32.totalorder %v2003_v52, 64 }
 0x1cb   :  { %v848_v2 = vadd.f32 %v1522_v1, %v1490_v58  ;;  %v894_v3 = vpack.c.bf16 %v883_v61, %v882_v60  ;;  %v870_v8 = vadd.f32 %v1918_v7, %v837_v62  ;;  %v888_v16 = vmax.f32 %v872_v11, 0.0 }
 0x1cc   :  { %v839_v5 = vpop.f32.mrf.mxu0 }
 0x1cd   :  { %v873_v9 = vadd.f32 %v1918_v7, %v848_v2  ;;  %v840_v10 = vadd.f32 %v839_v5, %v694_v4  ;;  %1547 = vmatprep.mubr.bf16.mxu1 %v894_v3  ;;  %v886_v14 = vmax.f32 %v870_v8, 0.0 }
 0x1ce   :  { %1548 = vmatmul.mubr.bf16.gmra.mxu1 %v895_v6 }
 0x1cf   :  { %v871_v12 = vadd.f32 %v1918_v7, %v840_v10  ;;  %v889_v13 = vmax.f32 %v873_v9, 0.0 }
 0x1d1   :  { %v887_v15 = vmax.f32 %v871_v12, 0.0  ;;  %v897_v18 = vpack.c.bf16 %v889_v13, %v888_v16 }
 0x1d3   :  { %v896_v17 = vpack.c.bf16 %v887_v15, %v886_v14 }
 0x1d5   :  { %1551 = vmatprep.mubr.bf16.mxu1 %v896_v17 }
 0x1d6   :  { %1552 = vmatmul.mubr.bf16.gmra.mxu1 %v897_v18 }
 0x27e   :  { %v1541_v20 = vpop.f32.mrf.mxu1 }
 0x27f   :  { %v1939_v21 = vadd.f32 %v1541_v20, %v1338_v19 }
 0x280   :  { %v1003_v22 = vpop.f32.mrf.mxu1 }
 0x281   :  { %1070 = vrot.lane.b32.xlu0 %v1939_v21, %s1672_s22  ;;  %v1943_v23 = vadd.f32 %v1338_v19, %v1003_v22 }
 0x282   :  { %v1542_v7 = vpop.f32.mrf.mxu1 }
 0x283   :  { %v1945_v24 = vadd.f32 %v1542_v7, %v1338_v19 }
 0x284   :  { %v1006_v25 = vpop.f32.mrf.mxu1 }
 0x285   :  { %1072 = vrot.lane.b32.xlu1 %v1945_v24, %s1672_s22  ;;  %1066 = vrot.lane.b32.xlu0 %v1943_v23, %s1672_s22  ;;  %v1951_v27 = vadd.f32 %v1338_v19, %v1006_v25 }
 0x286   :  { %v1545_v26 = vpop.f32.mrf.mxu1 }
 0x287   :  { %v1953_v28 = vadd.f32 %v1545_v26, %v1338_v19 }
 0x288   :  { %v1019_v29 = vpop.f32.mrf.mxu1 }
 0x289   :  { %1068 = vrot.lane.b32.xlu1 %v1951_v27, %s1672_s22  ;;  %1078 = vrot.lane.b32.xlu0 %v1953_v28, %s1672_s22  ;;  %v1959_v31 = vadd.f32 %v1338_v19, %v1019_v29 }
 0x28a   :  { %v1546_v30 = vpop.f32.mrf.mxu1 }
 0x28b   :  { %v1961_v32 = vadd.f32 %v1546_v30, %v1338_v19 }
 0x28c   :  { %v1022_v33 = vpop.f32.mrf.mxu1 }
 0x28d   :  { %1080 = vrot.lane.b32.xlu1 %v1961_v32, %s1672_s22  ;;  %1074 = vrot.lane.b32.xlu0 %v1959_v31, %s1672_s22  ;;  %v1967_v35 = vadd.f32 %v1338_v19, %v1022_v33 }
 0x28e   :  { %v1549_v34 = vpop.f32.mrf.mxu1 }
 0x28f   :  { %v1969_v36 = vadd.f32 %v1549_v34, %v1338_v19 }
 0x290   :  { %v1035_v37 = vpop.f32.mrf.mxu1 }
 0x291   :  { %1076 = vrot.lane.b32.xlu1 %v1967_v35, %s1672_s22  ;;  %1086 = vrot.lane.b32.xlu0 %v1969_v36, %s1672_s22  ;;  %v1975_v39 = vadd.f32 %v1338_v19, %v1035_v37 }
 0x292   :  { %v1550_v38 = vpop.f32.mrf.mxu1 }
 0x293   :  { %v1977_v40 = vadd.f32 %v1550_v38, %v1338_v19 }
 0x294   :  { %v1038_v41 = vpop.f32.mrf.mxu1 }
 0x295   :  { %1088 = vrot.lane.b32.xlu1 %v1977_v40, %s1672_s22  ;;  %1082 = vrot.lane.b32.xlu0 %v1975_v39, %s1672_s22  ;;  %v1983_v43 = vadd.f32 %v1338_v19, %v1038_v41 }
 0x296   :  { %v1553_v42 = vpop.f32.mrf.mxu1 }
 0x297   :  { %v1991_v48 = vadd.f32 %v1553_v42, %v1338_v19 }
 0x298   :  { %v1051_v44 = vpop.f32.mrf.mxu1 }
 0x299   :  { %v1985_v45 = vadd.f32 %v1338_v19, %v1051_v44  ;;  %1084 = vrot.lane.b32.xlu1 %v1983_v43, %s1672_s22 }
 0x29a   :  { %v1554_v46 = vpop.f32.mrf.mxu1 }
 0x29b   :  { %1090 = vrot.lane.b32.xlu0 %v1985_v45, %s1672_s22  ;;  %v1999_v50 = vadd.f32 %v1554_v46, %v1338_v19 }
 0x29c   :  { %v1054_v47 = vpop.f32.mrf.mxu1 }
 0x29d   :  { %v1993_v49 = vadd.f32 %v1338_v19, %v1054_v47 }
 0x29f   :  { %1092 = vrot.lane.b32.xlu1 %v1993_v49, %s1672_s22  ;;  %1094 = vrot.lane.b32.xlu0 %v1991_v48, %s1672_s22 }
 0x2a3   :  { %1096 = vrot.lane.b32.xlu1 %v1999_v50, %s1672_s22 }
 0x2f3   :  { %v2006_v53 = vpop.permute.xlu0 %1070 }
 0x2f4   :  { %v1119_v54 = vsel %vm1100_vm0, %v2006_v53, %v1939_v21 }
 0x2f5   :  { %v1349_v55 = vmul.f32 -1.442695, %v1119_v54 }
 0x2f7   :  { %1607 = vpow2.f32 %v1349_v55  ;;  %v2012_v56 = vpop.permute.xlu1 %1072  ;;  %v2014_v57 = vpop.permute.xlu0 %1066 }
 0x2f8   :  { %v1120_v58 = vsel %vm1100_vm0, %v2012_v56, %v1945_v24  ;;  %v1117_v59 = vsel %vm1100_vm0, %v2014_v57, %v1943_v23 }
 0x2f9   :  { %v1350_v60 = vmul.f32 -1.442695, %v1120_v58  ;;  %v1347_v61 = vmul.f32 -1.442695, %v1117_v59 }
 0x2fb   :  { %1609 = vpow2.f32 %v1350_v60  ;;  %v2024_v62 = vpop.permute.xlu1 %1068  ;;  %v2026_v63 = vpop.permute.xlu0 %1078 }
 0x2fc   :  { %1611 = vpow2.f32 %v1347_v61  ;;  %v1118_v0 = vsel %vm1100_vm0, %v2024_v62, %v1951_v27  ;;  %v1123_v2 = vsel %vm1100_vm0, %v2026_v63, %v1953_v28 }
 0x2fd   :  { %v1348_v1 = vmul.f32 -1.442695, %v1118_v0  ;;  %v1353_v3 = vmul.f32 -1.442695, %v1123_v2 }
 0x2ff   :  { %1613 = vpow2.f32 %v1348_v1  ;;  %v2036_v4 = vpop.permute.xlu1 %1080  ;;  %v2038_v5 = vpop.permute.xlu0 %1074 }
 0x300   :  { %1615 = vpow2.f32 %v1353_v3  ;;  %v1124_v6 = vsel %vm1100_vm0, %v2036_v4, %v1961_v32  ;;  %v1121_v9 = vsel %vm1100_vm0, %v2038_v5, %v1959_v31 }
 0x301   :  { %v1354_v8 = vmul.f32 -1.442695, %v1124_v6  ;;  %v1351_v10 = vmul.f32 -1.442695, %v1121_v9  ;;  %v1103_v9 = vsel %vm1100_vm0, %v1939_v21, %v2006_v53 }
 0x303   :  { %1617 = vpow2.f32 %v1354_v8  ;;  %v2048_v11 = vpop.permute.xlu1 %1076  ;;  %v2050_v12 = vpop.permute.xlu0 %1086 }
 0x304   :  { %v1608_v13 = vpop.eup %1607  ;;  %1619 = vpow2.f32 %v1351_v10  ;;  %v1122_v14 = vsel %vm1100_vm0, %v2048_v11, %v1967_v35  ;;  %v1127_v17 = vsel %vm1100_vm0, %v2050_v12, %v1969_v36 }
 0x305   :  { %v1183_v15 = vadd.f32 1.0, %v1608_v13  ;;  %v1352_v16 = vmul.f32 -1.442695, %v1122_v14  ;;  %v1357_v18 = vmul.f32 -1.442695, %v1127_v17 }
 0x307   :  { %1621 = vrcp.f32 %v1183_v15  ;;  %v2060_v19 = vpop.permute.xlu1 %1088  ;;  %v2062_v20 = vpop.permute.xlu0 %1082 }
 0x308   :  { %v1610_v22 = vpop.eup %1609  ;;  %1623 = vpow2.f32 %v1352_v16  ;;  %v1128_v7 = vsel %vm1100_vm0, %v2060_v19, %v1977_v40  ;;  %v1125_v30 = vsel %vm1100_vm0, %v2062_v20, %v1975_v39 }
 0x309   :  { %v1612_v25 = vpop.eup %1611  ;;  %v1184_v26 = vadd.f32 1.0, %v1610_v22  ;;  %1625 = vpow2.f32 %v1357_v18  ;;  %v1358_v29 = vmul.f32 -1.442695, %v1128_v7  ;;  %v1355_v34 = vmul.f32 -1.442695, %v1125_v30 }
 0x30a   :  { %v1181_v33 = vadd.f32 1.0, %v1612_v25 }
 0x30b   :  { %1627 = vrcp.f32 %v1184_v26  ;;  %v2072_v37 = vpop.permute.xlu1 %1084  ;;  %v1104_v26 = vsel %vm1100_vm0, %v1945_v24, %v2012_v56 }
 0x30c   :  { %v1614_v38 = vpop.eup %1613  ;;  %1629 = vrcp.f32 %v1181_v33  ;;  %v1126_v41 = vsel %vm1100_vm0, %v2072_v37, %v1983_v43 }
 0x30d   :  { %v1616_v42 = vpop.eup %1615  ;;  %v1182_v44 = vadd.f32 1.0, %v1614_v38  ;;  %1631 = vpow2.f32 %v1358_v29  ;;  %v1356_v46 = vmul.f32 -1.442695, %v1126_v41  ;;  %v2078_v47 = vpop.permute.xlu0 %1090 }
 0x30e   :  { %v1187_v51 = vadd.f32 1.0, %v1616_v42  ;;  %1633 = vpow2.f32 %v1355_v34  ;;  %v1129_v54 = vsel %vm1100_vm0, %v2078_v47, %v1985_v45  ;;  %v1101_v34 = vsel %vm1100_vm0, %v1943_v23, %v2014_v57 }
 0x30f   :  { %1635 = vrcp.f32 %v1182_v44  ;;  %v1359_v55 = vmul.f32 -1.442695, %v1129_v54  ;;  %v1102_v23 = vsel %vm1100_vm0, %v1951_v27, %v2024_v62 }
 0x310   :  { %v1618_v58 = vpop.eup %1617  ;;  %1637 = vrcp.f32 %v1187_v51 }
 0x311   :  { %v1620_v59 = vpop.eup %1619  ;;  %v1188_v60 = vadd.f32 1.0, %v1618_v58  ;;  %1639 = vpow2.f32 %v1356_v46  ;;  %v2084_v61 = vpop.permute.xlu1 %1092 }
 0x312   :  { %v2086_v0 = vpop.permute.xlu0 %1094  ;;  %v1185_v1 = vadd.f32 1.0, %v1620_v59  ;;  %1641 = vpow2.f32 %v1359_v55  ;;  %v1130_v2 = vsel %vm1100_vm0, %v2084_v61, %v1993_v49  ;;  %v1107_v59 = vsel %vm1100_vm0, %v1953_v28, %v2026_v63 }
 0x313   :  { %1643 = vrcp.f32 %v1188_v60  ;;  %v1360_v3 = vmul.f32 -1.442695, %v1130_v2  ;;  %v1131_v6 = vsel %vm1100_vm0, %v2086_v0, %v1991_v48  ;;  %v1108_v28 = vsel %vm1100_vm0, %v1961_v32, %v2036_v4 }
 0x314   :  { %v1622_v8 = vpop.eup %1621  ;;  %1645 = vrcp.f32 %v1185_v1  ;;  %v1361_v10 = vmul.f32 -1.442695, %v1131_v6 }
 0x315   :  { %v1624_v13 = vpop.eup %1623  ;;  %v1231_v14 = vsub.f32 %v1103_v9, %v1622_v8  ;;  %v1247_v15 = vadd.f32 %v1622_v8, %v1103_v9  ;;  %1647 = vpow2.f32 %v1360_v3  ;;  %v2100_v16 = vpop.permute.xlu1 %1096 }
 0x316   :  { %v1626_v17 = vpop.eup %1625  ;;  %v1186_v18 = vadd.f32 1.0, %v1624_v13  ;;  %1649 = vpow2.f32 %v1361_v10  ;;  %v1132_v22 = vsel %vm1100_vm0, %v2100_v16, %v1999_v50 }
 0x317   :  { %v1263_v7 = vsel %vm1100_vm0, %v1231_v14, %v1247_v15  ;;  %v1191_v21 = vadd.f32 1.0, %v1626_v17  ;;  %v1362_v53 = vmul.f32 -1.442695, %v1132_v22  ;;  %v1105_v14 = vsel %vm1100_vm0, %v1959_v31, %v2038_v5 }
 0x318   :  { %v1628_v25 = vpop.eup %1627  ;;  %1279 = vst [vmem:[%s2255_s9 + $0x10] sm:$0xff] %v1263_v7  ;;  %1651 = vrcp.f32 %v1186_v18  ;;  %v1106_v31 = vsel %vm1100_vm0, %v1967_v35, %v2048_v11 }
 0x319   :  { %v1630_v29 = vpop.eup %1629  ;;  %v1232_v30 = vsub.f32 %v1104_v26, %v1628_v25  ;;  %v1248_v33 = vadd.f32 %v1628_v25, %v1104_v26  ;;  %1653 = vrcp.f32 %v1191_v21 }
 0x31a   :  { %v1632_v38 = vpop.eup %1631  ;;  %v1229_v41 = vsub.f32 %v1101_v34, %v1630_v29  ;;  %v1245_v42 = vadd.f32 %v1630_v29, %v1101_v34  ;;  %1655 = vpow2.f32 %v1362_v53  ;;  %v1111_v29 = vsel %vm1100_vm0, %v1969_v36, %v2050_v12 }
 0x31b   :  { %v1634_v44 = vpop.eup %1633  ;;  %v1264_v46 = vsel %vm1100_vm0, %v1232_v30, %v1248_v33  ;;  %v1192_v51 = vadd.f32 1.0, %v1632_v38  ;;  %v1112_v36 = vsel %vm1100_vm0, %v1977_v40, %v2060_v19  ;;  %v1110_v19 = vsel %vm1100_vm0, %v1983_v43, %v2072_v37 }
 0x31c   :  { %v1636_v24 = vpop.eup %1635  ;;  %1280 = vst [vmem:[%s2255_s9 + $0x18] sm:$0xff] %v1264_v46  ;;  %v1261_v56 = vsel %vm1100_vm0, %v1229_v41, %v1245_v42  ;;  %v1189_v57 = vadd.f32 1.0, %v1634_v44  ;;  %v1109_v46 = vsel %vm1100_vm0, %v1975_v39, %v2062_v20  ;;  %v1114_v37 = vsel %vm1100_vm0, %v1993_v49, %v2084_v61 }
 0x31d   :  { %v1638_v54 = vpop.eup %1637  ;;  %1277 = vst [vmem:[%s2255_s9] sm:$0xff] %v1261_v56  ;;  %v1230_v55 = vsub.f32 %v1102_v23, %v1636_v24  ;;  %v1246_v58 = vadd.f32 %v1636_v24, %v1102_v23  ;;  %1657 = vrcp.f32 %v1192_v51 }
 0x31e   :  { %v1640_v60 = vpop.eup %1639  ;;  %v1235_v1 = vsub.f32 %v1107_v59, %v1638_v54  ;;  %v1251_v2 = vadd.f32 %v1638_v54, %v1107_v59  ;;  %1659 = vrcp.f32 %v1189_v57  ;;  %v1113_v54 = vsel %vm1100_vm0, %v1985_v45, %v2078_v47 }
 0x31f   :  { %v1642_v3 = vpop.eup %1641  ;;  %v1262_v27 = vsel %vm1100_vm0, %v1230_v55, %v1246_v58  ;;  %v1190_v62 = vadd.f32 1.0, %v1640_v60 }
 0x320   :  { %v1644_v6 = vpop.eup %1643  ;;  %1278 = vst [vmem:[%s2255_s9 + $0x8] sm:$0xff] %v1262_v27  ;;  %v1267_v8 = vsel %vm1100_vm0, %v1235_v1, %v1251_v2  ;;  %v1193_v63 = vadd.f32 1.0, %v1642_v3  ;;  %v1115_v2 = vsel %vm1100_vm0, %v1991_v48, %v2086_v0  ;;  %v1116_v48 = vsel %vm1100_vm0, %v1999_v50, %v2100_v16 }
 0x321   :  { %v1646_v9 = vpop.eup %1645  ;;  %1283 = vst [vmem:[%s2255_s9 + $0x30] sm:$0xff] %v1267_v8  ;;  %v1236_v10 = vsub.f32 %v1108_v28, %v1644_v6  ;;  %v1252_v13 = vadd.f32 %v1644_v6, %v1108_v28  ;;  %1661 = vrcp.f32 %v1190_v62 }
 0x322   :  { %v1648_v15 = vpop.eup %1647  ;;  %v1233_v17 = vsub.f32 %v1105_v14, %v1646_v9  ;;  %v1249_v18 = vadd.f32 %v1646_v9, %v1105_v14  ;;  %1663 = vrcp.f32 %v1193_v63 }
 0x323   :  { %v1650_v22 = vpop.eup %1649  ;;  %v1268_v32 = vsel %vm1100_vm0, %v1236_v10, %v1252_v13  ;;  %v1194_v4 = vadd.f32 1.0, %v1648_v15 }
 0x324   :  { %1284 = vst [vmem:[%s2255_s9 + $0x38] sm:$0xff] %v1268_v32  ;;  %v1265_v7 = vsel %vm1100_vm0, %v1233_v17, %v1249_v18  ;;  %v1195_v21 = vadd.f32 1.0, %v1650_v22 }
 0x325   :  { %v1652_v53 = vpop.eup %1651  ;;  %1281 = vst [vmem:[%s2255_s9 + $0x20] sm:$0xff] %v1265_v7  ;;  %1665 = vrcp.f32 %v1194_v4 }
 0x326   :  { %v1654_v5 = vpop.eup %1653  ;;  %v1234_v25 = vsub.f32 %v1106_v31, %v1652_v53  ;;  %v1250_v26 = vadd.f32 %v1652_v53, %v1106_v31  ;;  %1667 = vrcp.f32 %v1195_v21 }
 0x327   :  { %v1656_v30 = vpop.eup %1655  ;;  %v1239_v33 = vsub.f32 %v1111_v29, %v1654_v5  ;;  %v1255_v34 = vadd.f32 %v1654_v5, %v1111_v29 }
 0x328   :  { %v1266_v38 = vsel %vm1100_vm0, %v1234_v25, %v1250_v26  ;;  %v1196_v41 = vadd.f32 1.0, %v1656_v30 }
 0x329   :  { %1282 = vst [vmem:[%s2255_s9 + $0x28] sm:$0xff] %v1266_v38  ;;  %v1271_v35 = vsel %vm1100_vm0, %v1239_v33, %v1255_v34 }
 0x32a   :  { %v1658_v11 = vpop.eup %1657  ;;  %1287 = vst [vmem:[%s2255_s9 + $0x50] sm:$0xff] %v1271_v35  ;;  %1669 = vrcp.f32 %v1196_v41 }
 0x32b   :  { %v1660_v12 = vpop.eup %1659  ;;  %v1240_v42 = vsub.f32 %v1112_v36, %v1658_v11  ;;  %v1256_v44 = vadd.f32 %v1658_v11, %v1112_v36 }
 0x32c   :  { %v1237_v51 = vsub.f32 %v1109_v46, %v1660_v12  ;;  %v1253_v24 = vadd.f32 %v1660_v12, %v1109_v46 }
 0x32d   :  { %v1272_v56 = vsel %vm1100_vm0, %v1240_v42, %v1256_v44 }
 0x32e   :  { %v1662_v23 = vpop.eup %1661  ;;  %1288 = vst [vmem:[%s2255_s9 + $0x58] sm:$0xff] %v1272_v56  ;;  %v1269_v40 = vsel %vm1100_vm0, %v1237_v51, %v1253_v24 }
 0x32f   :  { %v1664_v57 = vpop.eup %1663  ;;  %1285 = vst [vmem:[%s2255_s9 + $0x40] sm:$0xff] %v1269_v40  ;;  %v1238_v39 = vsub.f32 %v1110_v19, %v1662_v23  ;;  %v1254_v20 = vadd.f32 %v1662_v23, %v1110_v19 }
 0x330   :  { %v1241_v55 = vsub.f32 %v1113_v54, %v1664_v57  ;;  %v1257_v58 = vadd.f32 %v1664_v57, %v1113_v54 }
 0x331   :  { %v1270_v59 = vsel %vm1100_vm0, %v1238_v39, %v1254_v20 }
 0x332   :  { %v1666_v60 = vpop.eup %1665  ;;  %1286 = vst [vmem:[%s2255_s9 + $0x48] sm:$0xff] %v1270_v59  ;;  %v1273_v43 = vsel %vm1100_vm0, %v1241_v55, %v1257_v58 }
 0x333   :  { %v1668_v1 = vpop.eup %1667  ;;  %1289 = vst [vmem:[%s2255_s9 + $0x60] sm:$0xff] %v1273_v43  ;;  %v1242_v45 = vsub.f32 %v1114_v37, %v1666_v60  ;;  %v1258_v47 = vadd.f32 %v1666_v60, %v1114_v37 }
 0x334   :  { %v1243_v3 = vsub.f32 %v1115_v2, %v1668_v1  ;;  %v1259_v27 = vadd.f32 %v1668_v1, %v1115_v2 }
 0x335   :  { %v1274_v62 = vsel %vm1100_vm0, %v1242_v45, %v1258_v47 }
 0x336   :  { %1290 = vst [vmem:[%s2255_s9 + $0x68] sm:$0xff] %v1274_v62  ;;  %v1275_v49 = vsel %vm1100_vm0, %v1243_v3, %v1259_v27 }
 0x337   :  { %v1670_v61 = vpop.eup %1669  ;;  %1291 = vst [vmem:[%s2255_s9 + $0x70] sm:$0xff] %v1275_v49 }
 0x338   :  { %v1244_v0 = vsub.f32 %v1116_v48, %v1670_v61  ;;  %v1260_v6 = vadd.f32 %v1670_v61, %v1116_v48 }
 0x33a   :  { %v1276_v8 = vsel %vm1100_vm0, %v1244_v0, %v1260_v6 }
 0x33b   :  { %1292 = vst [vmem:[%s2255_s9 + $0x78] sm:$0xff] %v1276_v8 }

</bundles_post_ra>
